<compile_context>
chip_gen: v7x
topology: tpu7x:2x2x1
jax: 0.10.0
libtpu: 0.0.40
codegen_flags: <defaults>
</compile_context>

<pallas_src>
import functools

import jax
import jax.numpy as jnp
from jax.experimental import pallas as pl
from jax.experimental.pallas import tpu as pltpu

LANE = 128


def _round_up(n, m):
    return ((n + m - 1) // m) * m


# ---------------------------------------------------------------------------
# Fused Pallas kernel: conv1 -> relu -> conv2 -> log_softmax
# ---------------------------------------------------------------------------
def arma_fused_kernel(x_ref, a_hbm_ref,
                      wi1_ref, wblk1_ref, v1_ref, b1_ref,
                      wi2_ref, wblk2_ref, v2_ref, b2_ref,
                      fold1_ref, fold2_ref,
                      out_ref,
                      a_vmem, a_sem,
                      *, num_stacks, num_class):
    f32 = jnp.float32
    bf16 = jnp.bfloat16
    inv_k = 1.0 / num_stacks

    # Single-buffered manual DMA of the (large) normalized adjacency HBM->VMEM.
    # The A-independent first-layer matmuls below overlap with the copy.
    a_copy = pltpu.make_async_copy(a_hbm_ref, a_vmem, a_sem)
    a_copy.start()

    x = x_ref[...]                                                   # [Np, Fp] bf16
    # skip connection: root = dropout(x) @ V + bias (dropout = identity, eval)
    root1 = (jnp.dot(x, v1_ref[...], preferred_element_type=f32)
             + b1_ref[...]).astype(bf16)                             # [Np, PW1]
    h = jnp.dot(x, wi1_ref[...], preferred_element_type=f32)         # [Np, PW1] f32

    a_copy.wait()
    a = a_vmem[...]                                                  # [Np, Np] bf16

    def hop(h_f32, root_bf16):
        # h <- relu(A @ h + root), all K stacks packed in one 128-lane tile
        p = jnp.dot(a, h_f32.astype(bf16), preferred_element_type=f32)
        return jnp.maximum(p + root_bf16, 0.0)                       # f32

    # ---------------- conv1: Fin -> hidden (K stacks, T=2, shared weights) ----
    h = hop(h, root1)                                                # t = 0
    h = jnp.dot(h.astype(bf16), wblk1_ref[...], preferred_element_type=f32)
    h = hop(h, root1)                                                # t = 1

    # stack mean via ones-valued fold matmul, f32 scale; outer F.relu (no-op,
    # each stack output is already >= 0) kept for faithfulness.
    h1 = jnp.dot(h.astype(bf16), fold1_ref[...],
                 preferred_element_type=f32) * inv_k
    h1 = jnp.maximum(h1, 0.0).astype(bf16)                           # [Np, 128]
    # F.dropout -> identity in eval mode

    # ---------------- conv2: hidden -> num_class -------------------------------
    root2 = (jnp.dot(h1, v2_ref[...], preferred_element_type=f32)
             + b2_ref[...]).astype(bf16)
    z = jnp.dot(h1, wi2_ref[...], preferred_element_type=f32)
    z = hop(z, root2)
    z = jnp.dot(z.astype(bf16), wblk2_ref[...], preferred_element_type=f32)
    z = hop(z, root2)

    zm = jnp.dot(z.astype(bf16), fold2_ref[...],
                 preferred_element_type=f32) * inv_k                 # [Np, 128]

    # ---------------- masked log_softmax over valid class lanes ----------------
    col = jax.lax.broadcasted_iota(jnp.int32, zm.shape, 1)
    logits = jnp.where(col < num_class, zm, -1e30)
    m = jnp.max(logits, axis=-1, keepdims=True)
    shifted = logits - m
    lse = jnp.log(jnp.sum(jnp.exp(shifted), axis=-1, keepdims=True))
    out_ref[...] = (shifted - lse).astype(out_ref.dtype)


def _vmem_limit_bytes(n_pad, f_pad):
    """Per-chip VMEM budget: what the resident-A design needs, capped by HW."""
    need = n_pad * n_pad * 2              # A (bf16, single-buffered scratch)
    need += 2 * n_pad * f_pad * 2         # x (bf16, BlockSpec double-buffered)
    need += 12 * n_pad * LANE * 4         # live [Np,128] intermediates (generous)
    need += 24 * LANE * LANE * 4          # packed weights / folds / biases
    need = int(need * 1.2) + (2 << 20)
    try:
        cap = pltpu.get_tpu_info().vmem_capacity_bytes   # 128 MiB v5e/v6e, 64 MiB v7x
    except Exception:
        cap = 64 << 20                     # conservative fallback, safe everywhere
    return max(32 << 20, min(need, int(cap * 0.85)))


def arma_pallas(x_pad, a_pad, wi1, wblk1, v1, b1, wi2, wblk2, v2, b2,
                fold1, fold2, *, num_stacks, num_class):
    """Single fused pallas_call; A stays in HBM and is manually DMA'd once."""
    Np = x_pad.shape[0]
    CP = fold2.shape[1]

    kernel = functools.partial(arma_fused_kernel, num_stacks=num_stacks,
                               num_class=num_class)

    def whole(shape):
        return pl.BlockSpec(shape, lambda i: (0, 0))

    grid_spec = pltpu.PrefetchScalarGridSpec(
        num_scalar_prefetch=0,
        grid=(1,),
        in_specs=[
            whole(x_pad.shape),                       # x (bf16)
            pl.BlockSpec(memory_space=pl.ANY),        # A in HBM; manual single-buffer DMA
            whole(wi1.shape), whole(wblk1.shape),     # conv1 init / shared (bf16)
            whole(v1.shape), whole(b1.shape),         # conv1 root (bf16) / bias (f32)
            whole(wi2.shape), whole(wblk2.shape),     # conv2 init / shared (bf16)
            whole(v2.shape), whole(b2.shape),         # conv2 root (bf16) / bias (f32)
            whole(fold1.shape), whole(fold2.shape),   # stack-mean fold matrices (bf16)
        ],
        out_specs=pl.BlockSpec((Np, CP), lambda i: (0, 0)),
        scratch_shapes=[
            pltpu.VMEM((Np, Np), jnp.bfloat16),       # resident A, single-buffered
            pltpu.SemaphoreType.DMA(()),
        ],
    )

    return pl.pallas_call(
        kernel,
        out_shape=jax.ShapeDtypeStruct((Np, CP), jnp.float32),
        grid_spec=grid_spec,
        compiler_params=pltpu.CompilerParams(
            dimension_semantics=("arbitrary",),
            vmem_limit_bytes=_vmem_limit_bytes(Np, x_pad.shape[1]),
        ),
    )(x_pad, a_pad, wi1, wblk1, v1, b1, wi2, wblk2, v2, b2, fold1, fold2)


# ---------------------------------------------------------------------------
# Glue: gcn_norm (dense, padded), weight packing, embeddings, full forward
# ---------------------------------------------------------------------------
def gcn_norm_dense_padded(edge_index, num_nodes, n_pad):
    """D^-1/2 A D^-1/2 (add_self_loops=False), scattered directly into the
    padded (n_pad, n_pad) buffer and cast to bf16 once."""
    row, col = edge_index[0], edge_index[1]
    w = jnp.ones(row.shape[0], jnp.float32)
    deg = jnp.zeros((num_nodes,), jnp.float32).at[col].add(w)
    dinv = jnp.where(deg > 0, 1.0 / jnp.sqrt(deg), 0.0)
    norm = dinv[row] * w * dinv[col]
    # message flows source(row) -> target(col): out[target] += norm * x[source]
    a = jnp.zeros((n_pad, n_pad), jnp.float32).at[col, row].add(norm)
    return a.astype(jnp.bfloat16)


def _wide_weight(w, fin_p, pw):
    """[K, Fin, Fout] -> [fin_p, pw] bf16; stack k occupies cols [k*Fout,(k+1)*Fout)."""
    K, Fin, Fout = w.shape
    out = jnp.zeros((fin_p, pw), jnp.float32)
    for k in range(K):
        out = out.at[:Fin, k * Fout:(k + 1) * Fout].set(w[k])
    return out.astype(jnp.bfloat16)


def _blockdiag_weight(w, pw):
    """[K, Fout, Fout] -> [pw, pw] bf16 block-diagonal (tight-packed stacks)."""
    K, Fout, _ = w.shape
    out = jnp.zeros((pw, pw), jnp.float32)
    for k in range(K):
        out = out.at[k * Fout:(k + 1) * Fout, k * Fout:(k + 1) * Fout].set(w[k])
    return out.astype(jnp.bfloat16)


def _wide_bias(b, pw):
    """[K, Fout] -> [1, pw] float32 (padding stays exactly zero)."""
    K, Fout = b.shape
    out = jnp.zeros((1, pw), jnp.float32)
    for k in range(K):
        out = out.at[0, k * Fout:(k + 1) * Fout].set(b[k])
    return out


def _fold_matrix(num_stacks, f_out, pw_in, pw_out):
    """Ones-valued fold: output col j = sum_k input col k*f_out + j (mean scale
    applied in f32 inside the kernel)."""
    rows = jnp.arange(pw_in)[:, None]
    cols = jnp.arange(pw_out)[None, :]
    hit = (rows % f_out == cols) & (rows < num_stacks * f_out) & (cols < f_out)
    return hit.astype(jnp.bfloat16)


def init_params(key, categories_nums, features_num, hidden, num_class,
                embed_size, num_stacks):
    keys = jax.random.split(key, 16)
    params = {}
    params["emb"] = [
        jax.random.normal(keys[i], (n, embed_size), jnp.float32)
        for i, n in enumerate(categories_nums)
    ]
    f_in = embed_size * len(categories_nums) + features_num

    def glorot(k, shape):
        fan_in, fan_out = shape[-2], shape[-1]
        lim = jnp.sqrt(6.0 / (fan_in + fan_out))
        return jax.random.uniform(k, shape, jnp.float32, -lim, lim)

    # conv1: Fin -> hidden
    params["c1_init"] = glorot(keys[4], (num_stacks, f_in, hidden))
    params["c1_w"] = glorot(keys[5], (num_stacks, hidden, hidden))
    params["c1_root"] = glorot(keys[6], (num_stacks, f_in, hidden))
    params["c1_b"] = jnp.zeros((num_stacks, hidden), jnp.float32)
    # conv2: hidden -> num_class
    params["c2_init"] = glorot(keys[7], (num_stacks, hidden, num_class))
    params["c2_w"] = glorot(keys[8], (num_stacks, num_class, num_class))
    params["c2_root"] = glorot(keys[9], (num_stacks, hidden, num_class))
    params["c2_b"] = jnp.zeros((num_stacks, num_class), jnp.float32)
    return params


def arma_forward(params, x, categories_value, edge_index, num_nodes):
    # embeddings + concat (glue)
    emb_res = [jnp.take(tbl, categories_value[:, i], axis=0)
               for i, tbl in enumerate(params["emb"])]
    h = jnp.concatenate([x] + emb_res, axis=1)                    # [N, Fin]
    # F.dropout(p=0.25) -> identity in eval mode
    # TODO(synk): training-mode dropout (RNG masks) not implemented; eval semantics only.

    N, Fin = h.shape
    K, _, hidden = params["c1_init"].shape
    num_class = params["c2_init"].shape[2]

    Np = _round_up(N, LANE)
    Fp = _round_up(Fin, LANE)
    PW1 = _round_up(K * hidden, LANE)       # 48 -> 128 : all stacks in ONE lane tile
    HP = _round_up(hidden, LANE)            # packed mean-hidden width (128)
    PW2 = _round_up(K * num_class, LANE)    # 6 -> 128
    CP = _round_up(num_class, LANE)         # output width (128)

    # padded inputs (bf16 for the MXU; padding is exactly zero)
    x_pad = jnp.zeros((Np, Fp), jnp.float32).at[:N, :Fin].set(h).astype(jnp.bfloat16)
    a_pad = gcn_norm_dense_padded(edge_index, N, Np)              # [Np, Np] bf16

    # pack per-stack weights into tight wide / block-diagonal forms (bf16)
    wi1 = _wide_weight(params["c1_init"], Fp, PW1)
    wblk1 = _blockdiag_weight(params["c1_w"], PW1)
    v1 = _wide_weight(params["c1_root"], Fp, PW1)
    b1 = _wide_bias(params["c1_b"], PW1)
    fold1 = _fold_matrix(K, hidden, PW1, HP)

    wi2 = _wide_weight(params["c2_init"], HP, PW2)
    wblk2 = _blockdiag_weight(params["c2_w"], PW2)
    v2 = _wide_weight(params["c2_root"], HP, PW2)
    b2 = _wide_bias(params["c2_b"], PW2)
    fold2 = _fold_matrix(K, num_class, PW2, CP)

    # TODO(synk): for graphs where A (Np^2 bf16) exceeds the per-chip VMEM budget
    # (esp. v7x 64 MiB/TC), switch to the streamed-A variant: H resident in VMEM,
    # A streamed in >=512-row tiles, one 'parallel' row-tile grid axis per hop so
    # both v7x TensorCores are used.
    out_pad = arma_pallas(x_pad, a_pad, wi1, wblk1, v1, b1,
                          wi2, wblk2, v2, b2, fold1, fold2,
                          num_stacks=K, num_class=num_class)
    return out_pad[:N, :num_class]


# ---------------------------------------------------------------------------
if __name__ == "__main__":
    key = jax.random.PRNGKey(0)
    k_x, k_cat, k_edge, k_param = jax.random.split(key, 4)

    # small synthetic graph
    num_nodes = 24
    features_num = 16
    categories_nums = [5, 7]
    embed_size = 8
    hidden = 16
    num_class = 2
    num_stacks = 3
    num_edges = 96

    x = jax.random.normal(k_x, (num_nodes, features_num), jnp.float32)
    categories_value = jnp.stack(
        [jax.random.randint(jax.random.fold_in(k_cat, i), (num_nodes,), 0, n)
         for i, n in enumerate(categories_nums)], axis=1)          # [N, n_cat]
    src = jax.random.randint(k_edge, (num_edges,), 0, num_nodes)
    dst = jax.random.randint(jax.random.fold_in(k_edge, 1), (num_edges,),
                             0, num_nodes)
    # symmetrize the edge set (typical undirected GNN graph)
    edge_index = jnp.stack([jnp.concatenate([src, dst]),
                            jnp.concatenate([dst, src])], axis=0)  # [2, 2E]

    params = init_params(k_param, categories_nums, features_num, hidden,
                         num_class, embed_size, num_stacks)

    out = arma_forward(params, x, categories_value, edge_index, num_nodes)
    out = jax.block_until_ready(out)

    assert out.shape == (num_nodes, num_class)
    # rows of log_softmax must (approximately) sum to 1 in prob space
    assert bool(jnp.allclose(jnp.sum(jnp.exp(out), axis=-1), 1.0, atol=1e-3))
    assert bool(jnp.all(jnp.isfinite(out)))
    print("KERNEL_OK")
</pallas_src>

<mosaic_0001>
module attributes {stable_mosaic.version = 11 : i64} {
  func.func @arma_fused_kernel(%arg0: i32, %arg1: memref<128x128xbf16, #tpu.memory_space<vmem>>, %arg2: memref<128x128xbf16, #tpu.memory_space<any>>, %arg3: memref<128x128xbf16, #tpu.memory_space<vmem>>, %arg4: memref<128x128xbf16, #tpu.memory_space<vmem>>, %arg5: memref<128x128xbf16, #tpu.memory_space<vmem>>, %arg6: memref<1x128xf32, #tpu.memory_space<vmem>>, %arg7: memref<128x128xbf16, #tpu.memory_space<vmem>>, %arg8: memref<128x128xbf16, #tpu.memory_space<vmem>>, %arg9: memref<128x128xbf16, #tpu.memory_space<vmem>>, %arg10: memref<1x128xf32, #tpu.memory_space<vmem>>, %arg11: memref<128x128xbf16, #tpu.memory_space<vmem>>, %arg12: memref<128x128xbf16, #tpu.memory_space<vmem>>, %arg13: memref<128x128xf32, #tpu.memory_space<vmem>>, %arg14: memref<128x128xbf16, #tpu.memory_space<vmem>>, %arg15: memref<!tpu.dma_semaphore, #tpu.memory_space<semaphore_mem>>) attributes {dimension_semantics = [#tpu.dimension_semantics<arbitrary>], iteration_bounds = array<i64: 1>, scalar_prefetch = 0 : i64, scratch_operands = 2 : i64, tpu.core_type = #tpu.core_type<tc>, window_params = [{pipeline_mode = #tpu.pipeline_mode<synchronous>, transform_indices = @transform_0, window_bounds = array<i64: 128, 128>}, {}, {pipeline_mode = #tpu.pipeline_mode<synchronous>, transform_indices = @transform_2, window_bounds = array<i64: 128, 128>}, {pipeline_mode = #tpu.pipeline_mode<synchronous>, transform_indices = @transform_3, window_bounds = array<i64: 128, 128>}, {pipeline_mode = #tpu.pipeline_mode<synchronous>, transform_indices = @transform_4, window_bounds = array<i64: 128, 128>}, {pipeline_mode = #tpu.pipeline_mode<synchronous>, transform_indices = @transform_5, window_bounds = array<i64: 1, 128>}, {pipeline_mode = #tpu.pipeline_mode<synchronous>, transform_indices = @transform_6, window_bounds = array<i64: 128, 128>}, {pipeline_mode = #tpu.pipeline_mode<synchronous>, transform_indices = @transform_7, window_bounds = array<i64: 128, 128>}, {pipeline_mode = #tpu.pipeline_mode<synchronous>, transform_indices = @transform_8, window_bounds = array<i64: 128, 128>}, {pipeline_mode = #tpu.pipeline_mode<synchronous>, transform_indices = @transform_9, window_bounds = array<i64: 1, 128>}, {pipeline_mode = #tpu.pipeline_mode<synchronous>, transform_indices = @transform_10, window_bounds = array<i64: 128, 128>}, {pipeline_mode = #tpu.pipeline_mode<synchronous>, transform_indices = @transform_11, window_bounds = array<i64: 128, 128>}, {pipeline_mode = #tpu.pipeline_mode<synchronous>, transform_indices = @transform_12, window_bounds = array<i64: 128, 128>}]} {
    tpu.enqueue_dma source(%arg2 : memref<128x128xbf16, #tpu.memory_space<any>>) target(%arg14 : memref<128x128xbf16, #tpu.memory_space<vmem>>) target_semaphore(%arg15 : memref<!tpu.dma_semaphore, #tpu.memory_space<semaphore_mem>>)
    %c0 = arith.constant 0 : index
    %c0_0 = arith.constant 0 : index
    %0 = vector.load %arg1[%c0, %c0_0] : memref<128x128xbf16, #tpu.memory_space<vmem>>, vector<128x128xbf16>
    %c0_1 = arith.constant 0 : index
    %c0_2 = arith.constant 0 : index
    %1 = vector.load %arg5[%c0_1, %c0_2] : memref<128x128xbf16, #tpu.memory_space<vmem>>, vector<128x128xbf16>
    %cst = arith.constant dense<0.000000e+00> : vector<128x128xf32>
    %2 = tpu.matmul %0, %1, %cst {dimension_numbers = #tpu.dot_dimension_numbers<[1], [0], [0], [1], [0, 0, 1, 1], [], []>} : vector<128x128xbf16>, vector<128x128xbf16>, vector<128x128xf32> -> vector<128x128xf32>
    %c0_3 = arith.constant 0 : index
    %c0_4 = arith.constant 0 : index
    %3 = vector.load %arg6[%c0_3, %c0_4] : memref<1x128xf32, #tpu.memory_space<vmem>>, vector<1x128xf32>
    %4 = vector.broadcast %3 : vector<1x128xf32> to vector<128x128xf32>
    %5 = arith.addf %2, %4 : vector<128x128xf32>
    %6 = arith.truncf %5 : vector<128x128xf32> to vector<128x128xbf16>
    %c0_5 = arith.constant 0 : index
    %c0_6 = arith.constant 0 : index
    %7 = vector.load %arg3[%c0_5, %c0_6] : memref<128x128xbf16, #tpu.memory_space<vmem>>, vector<128x128xbf16>
    %cst_7 = arith.constant dense<0.000000e+00> : vector<128x128xf32>
    %8 = tpu.matmul %0, %7, %cst_7 {dimension_numbers = #tpu.dot_dimension_numbers<[1], [0], [0], [1], [0, 0, 1, 1], [], []>} : vector<128x128xbf16>, vector<128x128xbf16>, vector<128x128xf32> -> vector<128x128xf32>
    tpu.wait_dma2 semaphore(%arg15 : memref<!tpu.dma_semaphore, #tpu.memory_space<semaphore_mem>>) src(%arg2 : memref<128x128xbf16, #tpu.memory_space<any>>) dst(%arg14 : memref<128x128xbf16, #tpu.memory_space<vmem>>)
    %c0_8 = arith.constant 0 : index
    %c0_9 = arith.constant 0 : index
    %9 = vector.load %arg14[%c0_8, %c0_9] : memref<128x128xbf16, #tpu.memory_space<vmem>>, vector<128x128xbf16>
    %10 = arith.truncf %8 : vector<128x128xf32> to vector<128x128xbf16>
    %cst_10 = arith.constant dense<0.000000e+00> : vector<128x128xf32>
    %11 = tpu.matmul %9, %10, %cst_10 {dimension_numbers = #tpu.dot_dimension_numbers<[1], [0], [0], [1], [0, 0, 1, 1], [], []>} : vector<128x128xbf16>, vector<128x128xbf16>, vector<128x128xf32> -> vector<128x128xf32>
    %12 = arith.extf %6 : vector<128x128xbf16> to vector<128x128xf32>
    %13 = arith.addf %11, %12 : vector<128x128xf32>
    %cst_11 = arith.constant 0.000000e+00 : f32
    %14 = vector.broadcast %cst_11 : f32 to vector<128x128xf32>
    %15 = arith.maximumf %13, %14 : vector<128x128xf32>
    %16 = arith.truncf %15 : vector<128x128xf32> to vector<128x128xbf16>
    %c0_12 = arith.constant 0 : index
    %c0_13 = arith.constant 0 : index
    %17 = vector.load %arg4[%c0_12, %c0_13] : memref<128x128xbf16, #tpu.memory_space<vmem>>, vector<128x128xbf16>
    %cst_14 = arith.constant dense<0.000000e+00> : vector<128x128xf32>
    %18 = tpu.matmul %16, %17, %cst_14 {dimension_numbers = #tpu.dot_dimension_numbers<[1], [0], [0], [1], [0, 0, 1, 1], [], []>} : vector<128x128xbf16>, vector<128x128xbf16>, vector<128x128xf32> -> vector<128x128xf32>
    %19 = arith.truncf %18 : vector<128x128xf32> to vector<128x128xbf16>
    %cst_15 = arith.constant dense<0.000000e+00> : vector<128x128xf32>
    %20 = tpu.matmul %9, %19, %cst_15 {dimension_numbers = #tpu.dot_dimension_numbers<[1], [0], [0], [1], [0, 0, 1, 1], [], []>} : vector<128x128xbf16>, vector<128x128xbf16>, vector<128x128xf32> -> vector<128x128xf32>
    %21 = arith.extf %6 : vector<128x128xbf16> to vector<128x128xf32>
    %22 = arith.addf %20, %21 : vector<128x128xf32>
    %cst_16 = arith.constant 0.000000e+00 : f32
    %23 = vector.broadcast %cst_16 : f32 to vector<128x128xf32>
    %24 = arith.maximumf %22, %23 : vector<128x128xf32>
    %25 = arith.truncf %24 : vector<128x128xf32> to vector<128x128xbf16>
    %c0_17 = arith.constant 0 : index
    %c0_18 = arith.constant 0 : index
    %26 = vector.load %arg11[%c0_17, %c0_18] : memref<128x128xbf16, #tpu.memory_space<vmem>>, vector<128x128xbf16>
    %cst_19 = arith.constant dense<0.000000e+00> : vector<128x128xf32>
    %27 = tpu.matmul %25, %26, %cst_19 {dimension_numbers = #tpu.dot_dimension_numbers<[1], [0], [0], [1], [0, 0, 1, 1], [], []>} : vector<128x128xbf16>, vector<128x128xbf16>, vector<128x128xf32> -> vector<128x128xf32>
    %cst_20 = arith.constant 0.333333343 : f32
    %28 = vector.broadcast %cst_20 : f32 to vector<128x128xf32>
    %29 = arith.mulf %27, %28 : vector<128x128xf32>
    %cst_21 = arith.constant 0.000000e+00 : f32
    %30 = vector.broadcast %cst_21 : f32 to vector<128x128xf32>
    %31 = arith.maximumf %29, %30 : vector<128x128xf32>
    %32 = arith.truncf %31 : vector<128x128xf32> to vector<128x128xbf16>
    %c0_22 = arith.constant 0 : index
    %c0_23 = arith.constant 0 : index
    %33 = vector.load %arg9[%c0_22, %c0_23] : memref<128x128xbf16, #tpu.memory_space<vmem>>, vector<128x128xbf16>
    %cst_24 = arith.constant dense<0.000000e+00> : vector<128x128xf32>
    %34 = tpu.matmul %32, %33, %cst_24 {dimension_numbers = #tpu.dot_dimension_numbers<[1], [0], [0], [1], [0, 0, 1, 1], [], []>} : vector<128x128xbf16>, vector<128x128xbf16>, vector<128x128xf32> -> vector<128x128xf32>
    %c0_25 = arith.constant 0 : index
    %c0_26 = arith.constant 0 : index
    %35 = vector.load %arg10[%c0_25, %c0_26] : memref<1x128xf32, #tpu.memory_space<vmem>>, vector<1x128xf32>
    %36 = vector.broadcast %35 : vector<1x128xf32> to vector<128x128xf32>
    %37 = arith.addf %34, %36 : vector<128x128xf32>
    %38 = arith.truncf %37 : vector<128x128xf32> to vector<128x128xbf16>
    %c0_27 = arith.constant 0 : index
    %c0_28 = arith.constant 0 : index
    %39 = vector.load %arg7[%c0_27, %c0_28] : memref<128x128xbf16, #tpu.memory_space<vmem>>, vector<128x128xbf16>
    %cst_29 = arith.constant dense<0.000000e+00> : vector<128x128xf32>
    %40 = tpu.matmul %32, %39, %cst_29 {dimension_numbers = #tpu.dot_dimension_numbers<[1], [0], [0], [1], [0, 0, 1, 1], [], []>} : vector<128x128xbf16>, vector<128x128xbf16>, vector<128x128xf32> -> vector<128x128xf32>
    %41 = arith.truncf %40 : vector<128x128xf32> to vector<128x128xbf16>
    %cst_30 = arith.constant dense<0.000000e+00> : vector<128x128xf32>
    %42 = tpu.matmul %9, %41, %cst_30 {dimension_numbers = #tpu.dot_dimension_numbers<[1], [0], [0], [1], [0, 0, 1, 1], [], []>} : vector<128x128xbf16>, vector<128x128xbf16>, vector<128x128xf32> -> vector<128x128xf32>
    %43 = arith.extf %38 : vector<128x128xbf16> to vector<128x128xf32>
    %44 = arith.addf %42, %43 : vector<128x128xf32>
    %cst_31 = arith.constant 0.000000e+00 : f32
    %45 = vector.broadcast %cst_31 : f32 to vector<128x128xf32>
    %46 = arith.maximumf %44, %45 : vector<128x128xf32>
    %47 = arith.truncf %46 : vector<128x128xf32> to vector<128x128xbf16>
    %c0_32 = arith.constant 0 : index
    %c0_33 = arith.constant 0 : index
    %48 = vector.load %arg8[%c0_32, %c0_33] : memref<128x128xbf16, #tpu.memory_space<vmem>>, vector<128x128xbf16>
    %cst_34 = arith.constant dense<0.000000e+00> : vector<128x128xf32>
    %49 = tpu.matmul %47, %48, %cst_34 {dimension_numbers = #tpu.dot_dimension_numbers<[1], [0], [0], [1], [0, 0, 1, 1], [], []>} : vector<128x128xbf16>, vector<128x128xbf16>, vector<128x128xf32> -> vector<128x128xf32>
    %50 = arith.truncf %49 : vector<128x128xf32> to vector<128x128xbf16>
    %cst_35 = arith.constant dense<0.000000e+00> : vector<128x128xf32>
    %51 = tpu.matmul %9, %50, %cst_35 {dimension_numbers = #tpu.dot_dimension_numbers<[1], [0], [0], [1], [0, 0, 1, 1], [], []>} : vector<128x128xbf16>, vector<128x128xbf16>, vector<128x128xf32> -> vector<128x128xf32>
    %52 = arith.extf %38 : vector<128x128xbf16> to vector<128x128xf32>
    %53 = arith.addf %51, %52 : vector<128x128xf32>
    %cst_36 = arith.constant 0.000000e+00 : f32
    %54 = vector.broadcast %cst_36 : f32 to vector<128x128xf32>
    %55 = arith.maximumf %53, %54 : vector<128x128xf32>
    %56 = arith.truncf %55 : vector<128x128xf32> to vector<128x128xbf16>
    %c0_37 = arith.constant 0 : index
    %c0_38 = arith.constant 0 : index
    %57 = vector.load %arg12[%c0_37, %c0_38] : memref<128x128xbf16, #tpu.memory_space<vmem>>, vector<128x128xbf16>
    %cst_39 = arith.constant dense<0.000000e+00> : vector<128x128xf32>
    %58 = tpu.matmul %56, %57, %cst_39 {dimension_numbers = #tpu.dot_dimension_numbers<[1], [0], [0], [1], [0, 0, 1, 1], [], []>} : vector<128x128xbf16>, vector<128x128xbf16>, vector<128x128xf32> -> vector<128x128xf32>
    %cst_40 = arith.constant 0.333333343 : f32
    %59 = vector.broadcast %cst_40 : f32 to vector<128x128xf32>
    %60 = arith.mulf %58, %59 : vector<128x128xf32>
    %61 = tpu.iota {dimensions = array<i32: 1>} : vector<128x128xi32>
    %c2_i32 = arith.constant 2 : i32
    %62 = vector.broadcast %c2_i32 : i32 to vector<128x128xi32>
    %63 = arith.cmpi slt, %61, %62 : vector<128x128xi32>
    %cst_41 = arith.constant -1.000000e+30 : f32
    %64 = vector.broadcast %cst_41 : f32 to vector<128x128xf32>
    %65 = arith.select %63, %60, %64 : vector<128x128xi1>, vector<128x128xf32>
    %cst_42 = arith.constant dense<0xFF800000> : vector<128xf32>
    %66 = vector.multi_reduction <maximumf>, %65, %cst_42 [1] : vector<128x128xf32> to vector<128xf32>
    %67 = vector.shape_cast %66 : vector<128xf32> to vector<128x1xf32>
    %68 = vector.broadcast %67 : vector<128x1xf32> to vector<128x128xf32>
    %69 = arith.subf %65, %68 : vector<128x128xf32>
    %70 = math.exp %69 : vector<128x128xf32>
    %cst_43 = arith.constant dense<0.000000e+00> : vector<128xf32>
    %71 = vector.multi_reduction <add>, %70, %cst_43 [1] : vector<128x128xf32> to vector<128xf32>
    %72 = vector.shape_cast %71 : vector<128xf32> to vector<128x1xf32>
    %73 = math.log %72 : vector<128x1xf32>
    %74 = vector.broadcast %73 : vector<128x1xf32> to vector<128x128xf32>
    %75 = arith.subf %69, %74 : vector<128x128xf32>
    %c0_44 = arith.constant 0 : index
    %c0_45 = arith.constant 0 : index
    %76 = vector.load %arg13[%c0_44, %c0_45] : memref<128x128xf32, #tpu.memory_space<vmem>>, vector<128x128xf32>
    tpu.vector_store %arg13[%c0_44, %c0_45], %75 {strides = array<i32>} : memref<128x128xf32, #tpu.memory_space<vmem>>, vector<128x128xf32>,
    return
  }
  func.func @transform_0(%arg0: i32) -> (i32, i32) {
    %c0_i32 = arith.constant 0 : i32
    %c0_i32_0 = arith.constant 0 : i32
    %c0_i32_1 = arith.constant 0 : i32
    return %c0_i32, %c0_i32_0 : i32, i32
  }
  func.func @transform_2(%arg0: i32) -> (i32, i32) {
    %c0_i32 = arith.constant 0 : i32
    %c0_i32_0 = arith.constant 0 : i32
    %c0_i32_1 = arith.constant 0 : i32
    return %c0_i32, %c0_i32_0 : i32, i32
  }
  func.func @transform_3(%arg0: i32) -> (i32, i32) {
    %c0_i32 = arith.constant 0 : i32
    %c0_i32_0 = arith.constant 0 : i32
    %c0_i32_1 = arith.constant 0 : i32
    return %c0_i32, %c0_i32_0 : i32, i32
  }
  func.func @transform_4(%arg0: i32) -> (i32, i32) {
    %c0_i32 = arith.constant 0 : i32
    %c0_i32_0 = arith.constant 0 : i32
    %c0_i32_1 = arith.constant 0 : i32
    return %c0_i32, %c0_i32_0 : i32, i32
  }
  func.func @transform_5(%arg0: i32) -> (i32, i32) {
    %c0_i32 = arith.constant 0 : i32
    %c0_i32_0 = arith.constant 0 : i32
    %c0_i32_1 = arith.constant 0 : i32
    return %c0_i32, %c0_i32_0 : i32, i32
  }
  func.func @transform_6(%arg0: i32) -> (i32, i32) {
    %c0_i32 = arith.constant 0 : i32
    %c0_i32_0 = arith.constant 0 : i32
    %c0_i32_1 = arith.constant 0 : i32
    return %c0_i32, %c0_i32_0 : i32, i32
  }
  func.func @transform_7(%arg0: i32) -> (i32, i32) {
    %c0_i32 = arith.constant 0 : i32
    %c0_i32_0 = arith.constant 0 : i32
    %c0_i32_1 = arith.constant 0 : i32
    return %c0_i32, %c0_i32_0 : i32, i32
  }
  func.func @transform_8(%arg0: i32) -> (i32, i32) {
    %c0_i32 = arith.constant 0 : i32
    %c0_i32_0 = arith.constant 0 : i32
    %c0_i32_1 = arith.constant 0 : i32
    return %c0_i32, %c0_i32_0 : i32, i32
  }
  func.func @transform_9(%arg0: i32) -> (i32, i32) {
    %c0_i32 = arith.constant 0 : i32
    %c0_i32_0 = arith.constant 0 : i32
    %c0_i32_1 = arith.constant 0 : i32
    return %c0_i32, %c0_i32_0 : i32, i32
  }
  func.func @transform_10(%arg0: i32) -> (i32, i32) {
    %c0_i32 = arith.constant 0 : i32
    %c0_i32_0 = arith.constant 0 : i32
    %c0_i32_1 = arith.constant 0 : i32
    return %c0_i32, %c0_i32_0 : i32, i32
  }
  func.func @transform_11(%arg0: i32) -> (i32, i32) {
    %c0_i32 = arith.constant 0 : i32
    %c0_i32_0 = arith.constant 0 : i32
    %c0_i32_1 = arith.constant 0 : i32
    return %c0_i32, %c0_i32_0 : i32, i32
  }
  func.func @transform_12(%arg0: i32) -> (i32, i32) {
    %c0_i32 = arith.constant 0 : i32
    %c0_i32_0 = arith.constant 0 : i32
    %c0_i32_1 = arith.constant 0 : i32
    return %c0_i32, %c0_i32_0 : i32, i32
  }
}

</mosaic_0001>

<bundles_post_ra>
// kernel: tpu_custom_call.1
= control target key start
LH: loop header
LB: loop body
LE: loop exit
PB: predicated region body
PF: predicated region fallthrough
CT: control target
= control target key end

     0   :  { %17 = vsyncpa [#allocation5], 0  ;;  %s4106_s0 = inlined_call_operand.hbm [shape: bf16[128,128], index: 0, kind: input, shape index: {}]   ;;  %s4107_s1 = inlined_call_operand.hbm [shape: bf16[128,128], index: 1, kind: input, shape index: {}]   ;;  %s4108_s2 = inlined_call_operand.hbm [shape: bf16[128,128], index: 2, kind: input, shape index: {}]   ;;  %s4109_s3 = inlined_call_operand.hbm [shape: bf16[128,128], index: 3, kind: input, shape index: {}]   ;;  %s4110_s4 = inlined_call_operand.hbm [shape: bf16[128,128], index: 4, kind: input, shape index: {}]   ;;  %s4111_s5 = inlined_call_operand.vmem [shape: f32[1,128], index: 5, kind: input, shape index: {}]   ;;  %s4112_s6 = inlined_call_operand.hbm [shape: bf16[128,128], index: 6, kind: input, shape index: {}]   ;;  %s4113_s7 = inlined_call_operand.hbm [shape: bf16[128,128], index: 7, kind: input, shape index: {}]   ;;  %s4114_s8 = inlined_call_operand.hbm [shape: bf16[128,128], index: 8, kind: input, shape index: {}]   ;;  %s4115_s9 = inlined_call_operand.vmem [shape: f32[1,128], index: 9, kind: input, shape index: {}]   ;;  %s4116_s10 = inlined_call_operand.hbm [shape: bf16[128,128], index: 10, kind: input, shape index: {}]   ;;  %s4117_s11 = inlined_call_operand.hbm [shape: bf16[128,128], index: 11, kind: input, shape index: {}]   ;;  %s4118_s12 = inlined_call_operand.hbm [shape: f32[128,128], index: 12, kind: output, shape index: {}]  }
   0x1   :  { %18 = vsyncpa [#allocation8], 0 }
   0x2   :  { %19 = vsyncpa [#allocation11], 0 }
   0x3   :  { %20 = vsyncpa [#allocation14], 0 }
   0x4   :  { %21 = vsyncpa [#allocation17], 0 }
   0x5   :  { %22 = vsyncpa [#allocation6], 0  ;;  %s3460_s21 = smov [#allocation7]   ;;  %s3461_s23 = smov [#allocation10]  }
   0x6   :  { %s40_s22 = sshll.u32 %s3460_s21, 4  ;;  %s64_s24 = sshll.u32 %s3461_s23, 4  ;;  %s41_s22 = int_to_ptr.vmem [resolvable:$true] %s40_s22  ;;  %s3540_s24 = int_to_ptr.vmem [resolvable:$true] %s64_s24 }
   0x7   :  { %s3204_s27 = scalar_lea.hbm %s4108_s2, 1024 }
   0x8   :  { %p3205_p0 = scmp.ne.s32.totalorder %s4108_s2, %s3204_s27  ;;  %p3208_p1 = scmp.lt.u32.totalorder %s3204_s27, %s4108_s2 }
   0xa   :  { %p3210_p2 = pnand %p3208_p1, %p3205_p0 }
   0xc   :  { %3213 = shalt.err (!%p3210_p2)
}
   0xd   :  { %s3214_s14 = scalar_lea.vmem %s41_s22, 1024  ;;  %p3219_p4 = scmp.lt.s32.totalorder %s41_s22, %s41_s22 }
   0xe   :  { %p3215_p3 = scmp.ne.s32.totalorder %s41_s22, %s3214_s14  ;;  %p3220_p5 = scmp.lt.s32.totalorder %s3214_s14, %s3214_s14 }
  0x10   :  { %p3221_p6 = por %p3220_p5, %p3219_p4 }
  0x12   :  { %p3222_p7 = pnand %p3221_p6, %p3215_p3 }
  0x14   :  { %3225 = shalt.err (!%p3222_p7)
}
  0x15   :  { %s3462_s15 = smov 64   ;;  %s3463_s16 = smov 4  }
  0x16   :  { %46 = dma.hbm_to_vmem [thread:$0]  %s4108_s2, 1024, %s41_s22, [#allocation8], %s3462_s15, %s3462_s15, %s3463_s16  }
  0x17   :  { %s3226_s21 = scalar_lea.hbm %s4110_s4, 1024 }
  0x18   :  { %p3227_p8 = scmp.ne.s32.totalorder %s4110_s4, %s3226_s21  ;;  %p3230_p9 = scmp.lt.u32.totalorder %s3226_s21, %s4110_s4 }
  0x1a   :  { %p3232_p10 = pnand %p3230_p9, %p3227_p8 }
  0x1c   :  { %3235 = shalt.err (!%p3232_p10)
}
  0x1d   :  { %s3236_s28 = scalar_lea.vmem %s3540_s24, 1024  ;;  %p3241_p12 = scmp.lt.s32.totalorder %s3540_s24, %s3540_s24 }
  0x1e   :  { %p3237_p11 = scmp.ne.s32.totalorder %s3540_s24, %s3236_s28  ;;  %p3242_p13 = scmp.lt.s32.totalorder %s3236_s28, %s3236_s28 }
  0x20   :  { %p3243_p0 = por %p3242_p13, %p3241_p12 }
  0x22   :  { %p3244_p1 = pnand %p3243_p0, %p3237_p11 }
  0x24   :  { %3247 = shalt.err (!%p3244_p1)
}
  0x25   :  { %70 = dma.hbm_to_vmem [thread:$0]  %s4110_s4, 1024, %s3540_s24, [#allocation11], %s3462_s15, %s3462_s15, %s3463_s16  }
  0x26   :  { %s3464_s29 = smov [#allocation13]   ;;  %s3465_s13 = smov [#allocation16]  }
  0x27   :  { %s90_s30 = sshll.u32 %s3464_s29, 4  ;;  %s116_s14 = sshll.u32 %s3465_s13, 4  ;;  %s91_s30 = int_to_ptr.vmem [resolvable:$true] %s90_s30  ;;  %s3577_s14 = int_to_ptr.vmem [resolvable:$true] %s116_s14 }
  0x28   :  { %s3248_s19 = scalar_lea.hbm %s4113_s7, 1024 }
  0x29   :  { %p3249_p2 = scmp.ne.s32.totalorder %s4113_s7, %s3248_s19  ;;  %p3252_p3 = scmp.lt.u32.totalorder %s3248_s19, %s4113_s7 }
  0x2b   :  { %p3254_p4 = pnand %p3252_p3, %p3249_p2 }
  0x2d   :  { %3257 = shalt.err (!%p3254_p4)
}
  0x2e   :  { %s3258_s4 = scalar_lea.vmem %s91_s30, 1024  ;;  %p3263_p6 = scmp.lt.s32.totalorder %s91_s30, %s91_s30 }
  0x2f   :  { %p3259_p5 = scmp.ne.s32.totalorder %s91_s30, %s3258_s4  ;;  %p3264_p7 = scmp.lt.s32.totalorder %s3258_s4, %s3258_s4 }
  0x31   :  { %p3265_p8 = por %p3264_p7, %p3263_p6 }
  0x33   :  { %p3266_p9 = pnand %p3265_p8, %p3259_p5 }
  0x35   :  { %3269 = shalt.err (!%p3266_p9)
}
  0x36   :  { %96 = dma.hbm_to_vmem [thread:$0]  %s4113_s7, 1024, %s91_s30, [#allocation14], %s3462_s15, %s3462_s15, %s3463_s16  }
  0x37   :  { %s3270_s2 = scalar_lea.hbm %s4116_s10, 1024 }
  0x38   :  { %p3271_p10 = scmp.ne.s32.totalorder %s4116_s10, %s3270_s2  ;;  %p3274_p11 = scmp.lt.u32.totalorder %s3270_s2, %s4116_s10 }
  0x3a   :  { %p3276_p12 = pnand %p3274_p11, %p3271_p10 }
  0x3c   :  { %3279 = shalt.err (!%p3276_p12)
}
  0x3d   :  { %s3280_s18 = scalar_lea.vmem %s3577_s14, 1024  ;;  %p3285_p0 = scmp.lt.s32.totalorder %s3577_s14, %s3577_s14 }
  0x3e   :  { %p3281_p13 = scmp.ne.s32.totalorder %s3577_s14, %s3280_s18  ;;  %p3286_p1 = scmp.lt.s32.totalorder %s3280_s18, %s3280_s18 }
  0x40   :  { %p3287_p2 = por %p3286_p1, %p3285_p0 }
  0x42   :  { %p3288_p3 = pnand %p3287_p2, %p3281_p13 }
  0x44   :  { %3291 = shalt.err (!%p3288_p3)
}
  0x45   :  { %122 = dma.hbm_to_vmem [thread:$0]  %s4116_s10, 1024, %s3577_s14, [#allocation17], %s3462_s15, %s3462_s15, %s3463_s16  }
  0x46   :  { %s3466_s19 = smov [#allocation4]   ;;  %s3467_s21 = smov [#allocation9]  }
  0x47   :  { %s28_s20 = sshll.u32 %s3466_s19, 4  ;;  %s52_s23 = sshll.u32 %s3467_s21, 4  ;;  %s29_s20 = int_to_ptr.vmem [resolvable:$true] %s28_s20  ;;  %s3614_s23 = int_to_ptr.vmem [resolvable:$true] %s52_s23 }
  0x48   :  { %s3292_s24 = scalar_lea.hbm %s4106_s0, 1024 }
  0x49   :  { %p3293_p4 = scmp.ne.s32.totalorder %s4106_s0, %s3292_s24  ;;  %p3296_p5 = scmp.lt.u32.totalorder %s3292_s24, %s4106_s0 }
  0x4b   :  { %p3298_p6 = pnand %p3296_p5, %p3293_p4 }
  0x4d   :  { %3301 = shalt.err (!%p3298_p6)
}
  0x4e   :  { %s3302_s10 = scalar_lea.vmem %s29_s20, 1024  ;;  %p3307_p8 = scmp.lt.s32.totalorder %s29_s20, %s29_s20 }
  0x4f   :  { %p3303_p7 = scmp.ne.s32.totalorder %s29_s20, %s3302_s10  ;;  %p3308_p9 = scmp.lt.s32.totalorder %s3302_s10, %s3302_s10 }
  0x51   :  { %p3309_p10 = por %p3308_p9, %p3307_p8 }
  0x53   :  { %p3310_p11 = pnand %p3309_p10, %p3303_p7 }
  0x55   :  { %3313 = shalt.err (!%p3310_p11)
}
  0x56   :  { %34 = dma.hbm_to_vmem [thread:$0]  %s4106_s0, 1024, %s29_s20, [#allocation5], %s3462_s15, %s3462_s15, %s3463_s16  }
  0x57   :  { %s3314_s17 = scalar_lea.hbm %s4109_s3, 1024 }
  0x58   :  { %p3315_p12 = scmp.ne.s32.totalorder %s4109_s3, %s3314_s17  ;;  %p3318_p13 = scmp.lt.u32.totalorder %s3314_s17, %s4109_s3 }
  0x5a   :  { %p3320_p0 = pnand %p3318_p13, %p3315_p12 }
  0x5c   :  { %3323 = shalt.err (!%p3320_p0)
}
  0x5d   :  { %s3324_s21 = scalar_lea.vmem %s3614_s23, 1024  ;;  %p3329_p2 = scmp.lt.s32.totalorder %s3614_s23, %s3614_s23 }
  0x5e   :  { %p3325_p1 = scmp.ne.s32.totalorder %s3614_s23, %s3324_s21  ;;  %p3330_p3 = scmp.lt.s32.totalorder %s3324_s21, %s3324_s21 }
  0x60   :  { %p3331_p4 = por %p3330_p3, %p3329_p2 }
  0x62   :  { %p3332_p5 = pnand %p3331_p4, %p3325_p1 }
  0x64   :  { %3335 = shalt.err (!%p3332_p5)
}
  0x65   :  { %58 = dma.hbm_to_vmem [thread:$0]  %s4109_s3, 1024, %s3614_s23, [#allocation8], %s3462_s15, %s3462_s15, %s3463_s16  }
  0x66   :  { %s3468_s25 = smov [#allocation12]   ;;  %s3469_s24 = smov [#allocation15]  }
  0x67   :  { %s78_s4 = sshll.u32 %s3468_s25, 4  ;;  %s102_s26 = sshll.u32 %s3469_s24, 4  ;;  %s79_s4 = int_to_ptr.vmem [resolvable:$true] %s78_s4  ;;  %s3651_s26 = int_to_ptr.vmem [resolvable:$true] %s102_s26 }
  0x68   :  { %s3336_s2 = scalar_lea.hbm %s4112_s6, 1024 }
  0x69   :  { %p3337_p6 = scmp.ne.s32.totalorder %s4112_s6, %s3336_s2  ;;  %p3340_p7 = scmp.lt.u32.totalorder %s3336_s2, %s4112_s6 }
  0x6b   :  { %p3342_p8 = pnand %p3340_p7, %p3337_p6 }
  0x6d   :  { %3345 = shalt.err (!%p3342_p8)
}
  0x6e   :  { %s3346_s3 = scalar_lea.vmem %s79_s4, 1024  ;;  %p3351_p10 = scmp.lt.s32.totalorder %s79_s4, %s79_s4 }
  0x6f   :  { %p3347_p9 = scmp.ne.s32.totalorder %s79_s4, %s3346_s3  ;;  %p3352_p11 = scmp.lt.s32.totalorder %s3346_s3, %s3346_s3 }
  0x71   :  { %p3353_p12 = por %p3352_p11, %p3351_p10 }
  0x73   :  { %p3354_p13 = pnand %p3353_p12, %p3347_p9 }
  0x75   :  { %3357 = shalt.err (!%p3354_p13)
}
  0x76   :  { %84 = dma.hbm_to_vmem [thread:$0]  %s4112_s6, 1024, %s79_s4, [#allocation11], %s3462_s15, %s3462_s15, %s3463_s16  }
  0x77   :  { %s3358_s7 = scalar_lea.hbm %s4114_s8, 1024 }
  0x78   :  { %p3359_p0 = scmp.ne.s32.totalorder %s4114_s8, %s3358_s7  ;;  %p3362_p1 = scmp.lt.u32.totalorder %s3358_s7, %s4114_s8 }
  0x7a   :  { %p3364_p2 = pnand %p3362_p1, %p3359_p0 }
  0x7c   :  { %3367 = shalt.err (!%p3364_p2)
}
  0x7d   :  { %s3368_s20 = scalar_lea.vmem %s3651_s26, 1024  ;;  %p3373_p4 = scmp.lt.s32.totalorder %s3651_s26, %s3651_s26 }
  0x7e   :  { %p3369_p3 = scmp.ne.s32.totalorder %s3651_s26, %s3368_s20  ;;  %p3374_p5 = scmp.lt.s32.totalorder %s3368_s20, %s3368_s20 }
  0x80   :  { %p3375_p6 = por %p3374_p5, %p3373_p4 }
  0x82   :  { %p3376_p7 = pnand %p3375_p6, %p3369_p3 }
  0x84   :  { %3379 = shalt.err (!%p3376_p7)
}
  0x85   :  { %108 = dma.hbm_to_vmem [thread:$0]  %s4114_s8, 1024, %s3651_s26, [#allocation14], %s3462_s15, %s3462_s15, %s3463_s16  }
  0x86   :  { %s3470_s4 = smov [#allocation18]   ;;  %s3380_s2 = scalar_lea.hbm %s4117_s11, 1024 }
  0x87   :  { %s128_s24 = sshll.u32 %s3470_s4, 4  ;;  %p3381_p8 = scmp.ne.s32.totalorder %s4117_s11, %s3380_s2  ;;  %s129_s24 = int_to_ptr.vmem [resolvable:$true] %s128_s24 }
  0x88   :  { %p3384_p9 = scmp.lt.u32.totalorder %s3380_s2, %s4117_s11 }
  0x8a   :  { %p3386_p10 = pnand %p3384_p9, %p3381_p8 }
  0x8c   :  { %3389 = shalt.err (!%p3386_p10)
}
  0x8d   :  { %s3390_s3 = scalar_lea.vmem %s129_s24, 1024  ;;  %p3395_p12 = scmp.lt.s32.totalorder %s129_s24, %s129_s24 }
  0x8e   :  { %p3391_p11 = scmp.ne.s32.totalorder %s129_s24, %s3390_s3  ;;  %p3396_p13 = scmp.lt.s32.totalorder %s3390_s3, %s3390_s3 }
  0x90   :  { %p3397_p0 = por %p3396_p13, %p3395_p12 }
  0x92   :  { %p3398_p1 = pnand %p3397_p0, %p3391_p11 }
  0x94   :  { %3401 = shalt.err (!%p3398_p1)
}
  0x95   :  { %134 = dma.hbm_to_vmem [thread:$0]  %s4117_s11, 1024, %s129_s24, [#allocation17], %s3462_s15, %s3462_s15, %s3463_s16  }
  0x96   :  { %3446 = dma.done.wait [#allocation5], 1024  }
  0x97   :  { %3447 = vsyncadd [#allocation5], 4294966272 }
  0x98   :  { %3448 = dma.done.wait [#allocation8], 2048  }
  0x99   :  { %3449 = vsyncadd [#allocation8], 4294965248 }
  0x9a   :  { %3450 = dma.done.wait [#allocation11], 2048  }
  0x9b   :  { %3451 = vsyncadd [#allocation11], 4294965248 }
  0x9c   :  { %3452 = dma.done.wait [#allocation14], 2048  }
  0x9d   :  { %3453 = vsyncadd [#allocation14], 4294965248 }
  0x9e   :  { %3454 = dma.done.wait [#allocation17], 2048  }
  0x9f   :  { %3455 = vsyncadd [#allocation17], 4294965248  ;;  %v3060_v0 = vld [vmem:[#allocation10] sm:$0xff]   ;;  %v3062_v2 = vld [vmem:[#allocation10 + $0x8] sm:$0xff]   ;;  %s3471_s11 = smov [#allocation2]   ;;  %s3402_s13 = scalar_lea.hbm %s4107_s1, 1024 }
  0xa0   :  { %v3061_v1 = vld [vmem:[#allocation7] sm:$0xff]   ;;  %2661 = vmatprep.subr.bf16.mxu0 %v3060_v0  ;;  %v3063_v3 = vld [vmem:[#allocation7 + $0x8] sm:$0xff]   ;;  %v3064_v4 = vld [vmem:[#allocation10 + $0x10] sm:$0xff]   ;;  %s170_s15 = sshll.u32 %s3471_s11, 4  ;;  %p3403_p2 = scmp.ne.s32.totalorder %s4107_s1, %s3402_s13  ;;  %s171_s15 = int_to_ptr.vmem [resolvable:$true] %s170_s15 }
  0xa1   :  { %2693 = vmatprep.subr.bf16.mxu1 %v3061_v1  ;;  %2662 = vmatpush3.bf16.msra.mxu0 %v3060_v0  ;;  %v3065_v5 = vld [vmem:[#allocation7 + $0x10] sm:$0xff]   ;;  %v3066_v6 = vld [vmem:[#allocation10 + $0x18] sm:$0xff]   ;;  %v3068_v8 = vld [vmem:[#allocation10 + $0x20] sm:$0xff]   ;;  %p3406_p3 = scmp.lt.u32.totalorder %s3402_s13, %s4107_s1 }
  0xa2   :  { %2694 = vmatpush3.bf16.msra.mxu1 %v3061_v1  ;;  %2663 = vmatprep.subr.bf16.mxu0 %v3062_v2  ;;  %v3067_v7 = vld [vmem:[#allocation7 + $0x18] sm:$0xff]   ;;  %v3069_v9 = vld [vmem:[#allocation7 + $0x20] sm:$0xff]   ;;  %v3070_v10 = vld [vmem:[#allocation10 + $0x28] sm:$0xff]  }
  0xa3   :  { %2695 = vmatprep.subr.bf16.mxu1 %v3063_v3  ;;  %v3076_v11 = vld [vmem:[#allocation4] sm:$0xff]   ;;  %v3071_v12 = vld [vmem:[#allocation7 + $0x28] sm:$0xff]   ;;  %v3072_v13 = vld [vmem:[#allocation10 + $0x30] sm:$0xff]   ;;  %p3408_p4 = pnand %p3406_p3, %p3403_p2 }
  0xa4   :  { %2677 = vmatprep.mubr.bf16.mxu0 %v3076_v11  ;;  %2709 = vmatprep.mubr.bf16.mxu1 %v3076_v11  ;;  %v3073_v14 = vld [vmem:[#allocation7 + $0x30] sm:$0xff]   ;;  %v3074_v15 = vld [vmem:[#allocation10 + $0x38] sm:$0xff]   ;;  %v3077_v17 = vld [vmem:[#allocation4 + $0x8] sm:$0xff]  }
  0xa5   :  { %2664 = vmatpush3.bf16.msra.mxu0 %v3062_v2  ;;  %v3075_v16 = vld [vmem:[#allocation7 + $0x38] sm:$0xff]   ;;  %v3078_v18 = vld [vmem:[#allocation4 + $0x10] sm:$0xff]   ;;  %v3080_v20 = vld [vmem:[#allocation4 + $0x20] sm:$0xff]  }
  0xa6   :  { %2696 = vmatpush3.bf16.msra.mxu1 %v3063_v3  ;;  %2665 = vmatprep.subr.bf16.mxu0 %v3064_v4  ;;  %v3079_v19 = vld [vmem:[#allocation4 + $0x18] sm:$0xff]   ;;  %v3081_v21 = vld [vmem:[#allocation4 + $0x28] sm:$0xff]   ;;  %v3082_v22 = vld [vmem:[#allocation4 + $0x30] sm:$0xff]  }
  0xa7   :  { %2697 = vmatprep.subr.bf16.mxu1 %v3065_v5  ;;  %v3083_v23 = vld [vmem:[#allocation4 + $0x38] sm:$0xff]  }
  0xa9   :  { %2666 = vmatpush3.bf16.msra.mxu0 %v3064_v4 }
  0xaa   :  { %2698 = vmatpush3.bf16.msra.mxu1 %v3065_v5  ;;  %2667 = vmatprep.subr.bf16.mxu0 %v3066_v6 }
  0xab   :  { %2699 = vmatprep.subr.bf16.mxu1 %v3067_v7 }
  0xad   :  { %2668 = vmatpush3.bf16.msra.mxu0 %v3066_v6 }
  0xae   :  { %2700 = vmatpush3.bf16.msra.mxu1 %v3067_v7  ;;  %2669 = vmatprep.subr.bf16.mxu0 %v3068_v8 }
  0xaf   :  { %2701 = vmatprep.subr.bf16.mxu1 %v3069_v9 }
  0xb1   :  { %2670 = vmatpush3.bf16.msra.mxu0 %v3068_v8 }
  0xb2   :  { %2702 = vmatpush3.bf16.msra.mxu1 %v3069_v9  ;;  %2671 = vmatprep.subr.bf16.mxu0 %v3070_v10 }
  0xb3   :  { %2703 = vmatprep.subr.bf16.mxu1 %v3071_v12 }
  0xb5   :  { %2672 = vmatpush3.bf16.msra.mxu0 %v3070_v10 }
  0xb6   :  { %2704 = vmatpush3.bf16.msra.mxu1 %v3071_v12  ;;  %2673 = vmatprep.subr.bf16.mxu0 %v3072_v13 }
  0xb7   :  { %2705 = vmatprep.subr.bf16.mxu1 %v3073_v14 }
  0xb9   :  { %2674 = vmatpush3.bf16.msra.mxu0 %v3072_v13 }
  0xba   :  { %2706 = vmatpush3.bf16.msra.mxu1 %v3073_v14  ;;  %2675 = vmatprep.subr.bf16.mxu0 %v3074_v15 }
  0xbb   :  { %2707 = vmatprep.subr.bf16.mxu1 %v3075_v16 }
  0xbd   :  { %2676 = vmatpush3.bf16.msra.mxu0 %v3074_v15 }
  0xbe   :  { %2708 = vmatpush3.bf16.msra.mxu1 %v3075_v16 }
  0xc0   :  { %2678 = vmatmul.mubr.bf16.vlgmr.msra.gmra.mrb[0].mxu0 %v3077_v17 }
  0xc1   :  { %2710 = vmatmul.mubr.bf16.vlgmr.msra.gmra.mrb[0].mxu1 %v3077_v17  ;;  %2681 = vmatprep.mubr.bf16.mxu0 %v3078_v18 }
  0xc2   :  { %2713 = vmatprep.mubr.bf16.mxu1 %v3078_v18 }
  0xc8   :  { %2682 = vmatmul.mubr.bf16.gmra.mrb[4].mxu0 %v3079_v19 }
  0xc9   :  { %2714 = vmatmul.mubr.bf16.gmra.mrb[4].mxu1 %v3079_v19  ;;  %2685 = vmatprep.mubr.bf16.mxu0 %v3080_v20 }
  0xca   :  { %2717 = vmatprep.mubr.bf16.mxu1 %v3080_v20 }
  0xd0   :  { %2686 = vmatmul.mubr.bf16.gmra.mrb[8].mxu0 %v3081_v21 }
  0xd1   :  { %2718 = vmatmul.mubr.bf16.gmra.mrb[8].mxu1 %v3081_v21  ;;  %2689 = vmatprep.mubr.bf16.mxu0 %v3082_v22 }
  0xd2   :  { %2721 = vmatprep.mubr.bf16.mxu1 %v3082_v22 }
  0xd8   :  { %2690 = vmatmul.mubr.bf16.gmra.mrb[12].mxu0 %v3083_v23 }
  0xd9   :  { %2722 = vmatmul.mubr.bf16.gmra.mrb[12].mxu1 %v3083_v23 }
  0xda   :  { %3411 = shalt.err (!%p3408_p4)  }
  0xdb   :  { %s3412_s19 = scalar_lea.vmem %s171_s15, 1024  ;;  %p3417_p6 = scmp.lt.s32.totalorder %s171_s15, %s171_s15 }
  0xdc   :  { %p3413_p5 = scmp.ne.s32.totalorder %s171_s15, %s3412_s19  ;;  %p3418_p7 = scmp.lt.s32.totalorder %s3412_s19, %s3412_s19 }
  0xde   :  { %p3419_p8 = por %p3418_p7, %p3417_p6 }
  0xe0   :  { %p3420_p9 = pnand %p3419_p8, %p3413_p5 }
  0xe2   :  { %3423 = shalt.err (!%p3420_p9)  }
  0xe3   :  { %173 = dma.hbm_to_vmem [thread:$0]  %s4107_s1, 1024, %s171_s15, [#allocation3]  ;;  %v2394_v25 = vld [vmem:[%s4111_s5] ss:$0 sm:$0xff] }
 0x193   :  { %v2679_v24 = vpop.f32.mrb[0].mxu0 }
 0x194   :  { %v2711_v26 = vpop.f32.mrb[0].mxu1  ;;  %v343_v27 = vpop.f32.mrb[1].mxu0  ;;  %v352_v30 = vadd.f32 %v2679_v24, %v2394_v25 }
 0x195   :  { %v512_v28 = vpop.f32.mrb[1].mxu1  ;;  %v2680_v29 = vpop.f32.mrb[2].mxu0  ;;  %v344_v34 = vadd.f32 %v2394_v25, %v343_v27 }
 0x196   :  { %v355_v31 = vadd.f32 %v2680_v29, %v2394_v25  ;;  %v2712_v32 = vpop.f32.mrb[2].mxu1  ;;  %v346_v33 = vpop.f32.mrb[3].mxu0 }
 0x197   :  { %v347_v35 = vadd.f32 %v2394_v25, %v346_v33  ;;  %v515_v36 = vpop.f32.mrb[3].mxu1  ;;  %v588_v18 = vpack.c.bf16 %v2712_v32, %v2711_v26 }
 0x198   :  { %v3718_v37 = vpack.c.bf16 %v355_v31, %v352_v30  ;;  %v587_v17 = vpack.c.bf16 %v515_v36, %v512_v28 }
 0x199   :  { %v3720_v38 = vpack.c.bf16 %v347_v35, %v344_v34 }
 0x19b   :  { %v2683_v39 = vpop.f32.mrb[4].mxu0 }
 0x19c   :  { %v2715_v40 = vpop.f32.mrb[4].mxu1  ;;  %v359_v41 = vpop.f32.mrb[5].mxu0  ;;  %v368_v44 = vadd.f32 %v2683_v39, %v2394_v25 }
 0x19d   :  { %v528_v42 = vpop.f32.mrb[5].mxu1  ;;  %v2684_v43 = vpop.f32.mrb[6].mxu0  ;;  %v360_v48 = vadd.f32 %v2394_v25, %v359_v41 }
 0x19e   :  { %v371_v45 = vadd.f32 %v2684_v43, %v2394_v25  ;;  %v2716_v46 = vpop.f32.mrb[6].mxu1  ;;  %v362_v47 = vpop.f32.mrb[7].mxu0 }
 0x19f   :  { %v363_v49 = vadd.f32 %v2394_v25, %v362_v47  ;;  %v531_v50 = vpop.f32.mrb[7].mxu1 }
 0x1a0   :  { %v3722_v51 = vpack.c.bf16 %v371_v45, %v368_v44 }
 0x1a1   :  { %v3724_v52 = vpack.c.bf16 %v363_v49, %v360_v48 }
 0x1a3   :  { %v2687_v53 = vpop.f32.mrb[8].mxu0 }
 0x1a4   :  { %v2719_v54 = vpop.f32.mrb[8].mxu1  ;;  %v375_v55 = vpop.f32.mrb[9].mxu0  ;;  %v384_v58 = vadd.f32 %v2687_v53, %v2394_v25 }
 0x1a5   :  { %v544_v56 = vpop.f32.mrb[9].mxu1  ;;  %v2688_v57 = vpop.f32.mrb[10].mxu0  ;;  %v376_v62 = vadd.f32 %v2394_v25, %v375_v55 }
 0x1a6   :  { %v387_v59 = vadd.f32 %v2688_v57, %v2394_v25  ;;  %v2720_v60 = vpop.f32.mrb[10].mxu1  ;;  %v378_v61 = vpop.f32.mrb[11].mxu0 }
 0x1a7   :  { %v379_v63 = vadd.f32 %v2394_v25, %v378_v61  ;;  %v547_v0 = vpop.f32.mrb[11].mxu1 }
 0x1a8   :  { %v3726_v1 = vpack.c.bf16 %v387_v59, %v384_v58 }
 0x1a9   :  { %v3728_v2 = vpack.c.bf16 %v379_v63, %v376_v62 }
 0x1ab   :  { %v2691_v3 = vpop.f32.mrb[12].mxu0 }
 0x1ac   :  { %v2723_v4 = vpop.f32.mrb[12].mxu1  ;;  %v391_v5 = vpop.f32.mrb[13].mxu0  ;;  %v400_v8 = vadd.f32 %v2691_v3, %v2394_v25 }
 0x1ad   :  { %v560_v6 = vpop.f32.mrb[13].mxu1  ;;  %v2692_v7 = vpop.f32.mrb[14].mxu0  ;;  %v392_v12 = vadd.f32 %v2394_v25, %v391_v5 }
 0x1ae   :  { %v403_v9 = vadd.f32 %v2692_v7, %v2394_v25  ;;  %v2724_v10 = vpop.f32.mrb[14].mxu1  ;;  %v394_v11 = vpop.f32.mrb[15].mxu0 }
 0x1af   :  { %v395_v13 = vadd.f32 %v2394_v25, %v394_v11  ;;  %v563_v14 = vpop.f32.mrb[15].mxu1 }
 0x1b0   :  { %v3730_v15 = vpack.c.bf16 %v403_v9, %v400_v8 }
 0x1b1   :  { %v3732_v16 = vpack.c.bf16 %v395_v13, %v392_v12 }
 0x1b2   :  { %3456 = dma.done.wait [#allocation3], 1024 }
 0x1b3   :  { %3457 = vsyncadd [#allocation3], 4294966272  ;;  %2725 = vmatprep.subr.bf16.mxu0 %v587_v17  ;;  %v589_v19 = vpack.c.bf16 %v531_v50, %v528_v42  ;;  %v3734_v20 = vld [vmem:[#allocation2] sm:$0xff]  ;;  %v590_v21 = vpack.c.bf16 %v2716_v46, %v2715_v40  ;;  %v3085_v23 = vld [vmem:[#allocation9 + $0x8] sm:$0xff]   ;;  %v591_v24 = vpack.c.bf16 %v547_v0, %v544_v56  ;;  %v592_v26 = vpack.c.bf16 %v2720_v60, %v2719_v54 }
 0x1b4   :  { %2726 = vmatpush3.bf16.msra.mxu0 %v587_v17  ;;  %2741 = vmatprep.mubr.bf16.mxu0 %v3734_v20  ;;  %v3084_v22 = vld [vmem:[#allocation9] sm:$0xff]   ;;  %v3086_v25 = vld [vmem:[#allocation9 + $0x10] sm:$0xff]   ;;  %v3087_v27 = vld [vmem:[#allocation9 + $0x18] sm:$0xff]   ;;  %v593_v28 = vpack.c.bf16 %v563_v14, %v560_v6  ;;  %v594_v30 = vpack.c.bf16 %v2724_v10, %v2723_v4  ;;  %v597_v43 = vunpack.c.l.bf16 %v3718_v37  ;;  %v595_v44 = vunpack.c.l.bf16 %v3720_v38 }
 0x1b5   :  { %2727 = vmatprep.subr.bf16.mxu0 %v588_v18  ;;  %2757 = vmatprep.subr.bf16.mxu1 %v3084_v22  ;;  %v3088_v29 = vld [vmem:[#allocation9 + $0x20] sm:$0xff]   ;;  %v3089_v31 = vld [vmem:[#allocation9 + $0x28] sm:$0xff]   ;;  %v3739_v33 = vld [vmem:[#allocation2 + $0x10] sm:$0xff]  ;;  %v598_v45 = vunpack.c.h.bf16 %v3718_v37  ;;  %v596_v47 = vunpack.c.h.bf16 %v3720_v38  ;;  %v601_v59 = vunpack.c.l.bf16 %v3722_v51  ;;  %v599_v62 = vunpack.c.l.bf16 %v3724_v52 }
 0x1b6   :  { %2758 = vmatpush3.bf16.msra.mxu1 %v3084_v22  ;;  %v3737_v32 = vld [vmem:[#allocation2 + $0x8] sm:$0xff]  ;;  %v3743_v34 = vld [vmem:[#allocation2 + $0x18] sm:$0xff]  ;;  %v3745_v35 = vld [vmem:[#allocation2 + $0x20] sm:$0xff]  ;;  %v602_v0 = vunpack.c.h.bf16 %v3722_v51  ;;  %v600_v5 = vunpack.c.h.bf16 %v3724_v52  ;;  %v605_v17 = vunpack.c.l.bf16 %v3726_v1 }
 0x1b7   :  { %2759 = vmatprep.subr.bf16.mxu1 %v3085_v23  ;;  %v3749_v36 = vld [vmem:[#allocation2 + $0x28] sm:$0xff]  ;;  %v3751_v39 = vld [vmem:[#allocation2 + $0x30] sm:$0xff]  ;;  %v3755_v40 = vld [vmem:[#allocation2 + $0x38] sm:$0xff] }
 0x1b8   :  { %2728 = vmatpush3.bf16.msra.mxu0 %v588_v18  ;;  %v3090_v41 = vld [vmem:[#allocation9 + $0x30] sm:$0xff]   ;;  %v3091_v42 = vld [vmem:[#allocation9 + $0x38] sm:$0xff]  }
 0x1b9   :  { %2729 = vmatprep.subr.bf16.mxu0 %v589_v19 }
 0x1ba   :  { %2760 = vmatpush3.bf16.msra.mxu1 %v3085_v23  ;;  %v606_v23 = vunpack.c.h.bf16 %v3726_v1 }
 0x1bb   :  { %2761 = vmatprep.subr.bf16.mxu1 %v3086_v25 }
 0x1bc   :  { %2730 = vmatpush3.bf16.msra.mxu0 %v589_v19 }
 0x1bd   :  { %2731 = vmatprep.subr.bf16.mxu0 %v590_v21 }
 0x1be   :  { %2762 = vmatpush3.bf16.msra.mxu1 %v3086_v25 }
 0x1bf   :  { %2763 = vmatprep.subr.bf16.mxu1 %v3087_v27 }
 0x1c0   :  { %2732 = vmatpush3.bf16.msra.mxu0 %v590_v21  ;;  %v603_v21 = vunpack.c.l.bf16 %v3728_v2 }
 0x1c1   :  { %2733 = vmatprep.subr.bf16.mxu0 %v591_v24 }
 0x1c2   :  { %2764 = vmatpush3.bf16.msra.mxu1 %v3087_v27 }
 0x1c3   :  { %2765 = vmatprep.subr.bf16.mxu1 %v3088_v29 }
 0x1c4   :  { %2734 = vmatpush3.bf16.msra.mxu0 %v591_v24 }
 0x1c5   :  { %2735 = vmatprep.subr.bf16.mxu0 %v592_v26 }
 0x1c6   :  { %2766 = vmatpush3.bf16.msra.mxu1 %v3088_v29 }
 0x1c7   :  { %2767 = vmatprep.subr.bf16.mxu1 %v3089_v31 }
 0x1c8   :  { %2736 = vmatpush3.bf16.msra.mxu0 %v592_v26  ;;  %v604_v26 = vunpack.c.h.bf16 %v3728_v2 }
 0x1c9   :  { %2737 = vmatprep.subr.bf16.mxu0 %v593_v28 }
 0x1ca   :  { %2768 = vmatpush3.bf16.msra.mxu1 %v3089_v31 }
 0x1cb   :  { %2769 = vmatprep.subr.bf16.mxu1 %v3090_v41 }
 0x1cc   :  { %2738 = vmatpush3.bf16.msra.mxu0 %v593_v28 }
 0x1cd   :  { %2739 = vmatprep.subr.bf16.mxu0 %v594_v30 }
 0x1ce   :  { %2770 = vmatpush3.bf16.msra.mxu1 %v3090_v41 }
 0x1cf   :  { %2771 = vmatprep.subr.bf16.mxu1 %v3091_v42 }
 0x1d0   :  { %2740 = vmatpush3.bf16.msra.mxu0 %v594_v30 }
 0x1d2   :  { %2772 = vmatpush3.bf16.msra.mxu1 %v3091_v42 }
 0x1d3   :  { %2742 = vmatmul.mubr.bf16.vlgmr.msra.gmra.mrb[16].mxu0 %v3737_v32 }
 0x1d4   :  { %2745 = vmatprep.mubr.bf16.mxu0 %v3739_v33 }
 0x1db   :  { %2746 = vmatmul.mubr.bf16.gmra.mrb[20].mxu0 %v3743_v34 }
 0x1dc   :  { %2749 = vmatprep.mubr.bf16.mxu0 %v3745_v35 }
 0x1e3   :  { %2750 = vmatmul.mubr.bf16.gmra.mrb[24].mxu0 %v3749_v36 }
 0x1e4   :  { %2753 = vmatprep.mubr.bf16.mxu0 %v3751_v39 }
 0x1eb   :  { %2754 = vmatmul.mubr.bf16.gmra.mrb[28].mxu0 %v3755_v40 }
 0x1ec   :  { %2805 = vmatprep.mubr.bf16.mxu0 %v3734_v20 }
 0x2a6   :  { %v2743_v46 = vpop.f32.mrb[16].mxu0 }
 0x2a7   :  { %v654_v48 = vadd.f32 %v2743_v46, %v597_v43  ;;  %v645_v49 = vpop.f32.mrb[17].mxu0 }
 0x2a8   :  { %v646_v50 = vadd.f32 %v645_v49, %v595_v44  ;;  %v2744_v53 = vpop.f32.mrb[18].mxu0  ;;  %v609_v49 = vunpack.c.l.bf16 %v3730_v15 }
 0x2a9   :  { %v657_v54 = vadd.f32 %v2744_v53, %v598_v45  ;;  %v648_v55 = vpop.f32.mrb[19].mxu0  ;;  %v710_v57 = vmax.f32 %v654_v48, 0.0 }
 0x2aa   :  { %v649_v56 = vadd.f32 %v648_v55, %v596_v47  ;;  %v708_v60 = vmax.f32 %v646_v50, 0.0 }
 0x2ab   :  { %v711_v58 = vmax.f32 %v657_v54, 0.0  ;;  %v607_v54 = vunpack.c.l.bf16 %v3732_v16 }
 0x2ac   :  { %v709_v61 = vmax.f32 %v649_v56, 0.0  ;;  %v610_v56 = vunpack.c.h.bf16 %v3730_v15  ;;  %v3114_v15 = vld [vmem:[#allocation15 + $0x38] sm:$0xff]  }
 0x2ad   :  { %v725_v63 = vpack.c.bf16 %v711_v58, %v710_v57 }
 0x2ae   :  { %v2747_v3 = vpop.f32.mrb[20].mxu0  ;;  %v724_v4 = vpack.c.bf16 %v709_v61, %v708_v60  ;;  %v608_v60 = vunpack.c.h.bf16 %v3732_v16  ;;  %v3115_v16 = vld [vmem:[#allocation12 + $0x38] sm:$0xff]  }
 0x2af   :  { %v670_v6 = vadd.f32 %v2747_v3, %v601_v59  ;;  %v661_v7 = vpop.f32.mrb[21].mxu0 }
 0x2b0   :  { %v662_v8 = vadd.f32 %v661_v7, %v599_v62  ;;  %v2748_v9 = vpop.f32.mrb[22].mxu0  ;;  %2773 = vmatprep.mubr.bf16.mxu1 %v724_v4 }
 0x2b1   :  { %v673_v10 = vadd.f32 %v2748_v9, %v602_v0  ;;  %v664_v11 = vpop.f32.mrb[23].mxu0  ;;  %2774 = vmatmul.mubr.bf16.vlgmr.msra.gmra.mrb[16].mxu1 %v725_v63  ;;  %v714_v13 = vmax.f32 %v670_v6, 0.0 }
 0x2b2   :  { %v665_v12 = vadd.f32 %v664_v11, %v600_v5  ;;  %v712_v18 = vmax.f32 %v662_v8, 0.0 }
 0x2b3   :  { %v715_v14 = vmax.f32 %v673_v10, 0.0 }
 0x2b4   :  { %v713_v19 = vmax.f32 %v665_v12, 0.0 }
 0x2b5   :  { %v727_v22 = vpack.c.bf16 %v715_v14, %v714_v13 }
 0x2b6   :  { %v726_v24 = vpack.c.bf16 %v713_v19, %v712_v18  ;;  %v2751_v25 = vpop.f32.mrb[24].mxu0  ;;  %v3092_v18 = vld [vmem:[#allocation16] sm:$0xff]   ;;  %v3093_v19 = vld [vmem:[#allocation16 + $0x8] sm:$0xff]  }
 0x2b7   :  { %v686_v27 = vadd.f32 %v2751_v25, %v605_v17  ;;  %v677_v28 = vpop.f32.mrb[25].mxu0  ;;  %2821 = vmatprep.subr.bf16.mxu1 %v3092_v18  ;;  %v3096_v25 = vld [vmem:[#allocation16 + $0x20] sm:$0xff]  }
 0x2b8   :  { %v678_v29 = vadd.f32 %v677_v28, %v603_v21  ;;  %v2752_v30 = vpop.f32.mrb[26].mxu0  ;;  %2777 = vmatprep.mubr.bf16.mxu1 %v726_v24  ;;  %2822 = vmatpush3.bf16.msra.mxu1 %v3092_v18  ;;  %v3095_v24 = vld [vmem:[#allocation16 + $0x18] sm:$0xff]   ;;  %v3100_v18 = vld [vmem:[#allocation15] sm:$0xff]  }
 0x2b9   :  { %v689_v31 = vadd.f32 %v2752_v30, %v606_v23  ;;  %v680_v41 = vpop.f32.mrb[27].mxu0  ;;  %2778 = vmatmul.mubr.bf16.gmra.mrb[20].mxu1 %v727_v22  ;;  %v718_v46 = vmax.f32 %v686_v27, 0.0  ;;  %2823 = vmatprep.subr.bf16.mxu1 %v3093_v19  ;;  %v3094_v22 = vld [vmem:[#allocation16 + $0x10] sm:$0xff]   ;;  %v3097_v27 = vld [vmem:[#allocation16 + $0x28] sm:$0xff]  }
 0x2ba   :  { %v681_v42 = vadd.f32 %v680_v41, %v604_v26  ;;  %v716_v50 = vmax.f32 %v678_v29, 0.0 }
 0x2bb   :  { %v719_v48 = vmax.f32 %v689_v31, 0.0 }
 0x2bc   :  { %v717_v53 = vmax.f32 %v681_v42, 0.0  ;;  %2824 = vmatpush3.bf16.msra.mxu1 %v3093_v19  ;;  %v3101_v19 = vld [vmem:[#allocation12] sm:$0xff]  }
 0x2bd   :  { %v729_v55 = vpack.c.bf16 %v719_v48, %v718_v46  ;;  %2825 = vmatprep.subr.bf16.mxu1 %v3094_v22 }
 0x2be   :  { %v728_v57 = vpack.c.bf16 %v717_v53, %v716_v50  ;;  %v2755_v58 = vpop.f32.mrb[28].mxu0 }
 0x2bf   :  { %v702_v61 = vadd.f32 %v2755_v58, %v609_v49  ;;  %v693_v63 = vpop.f32.mrb[29].mxu0 }
 0x2c0   :  { %v694_v3 = vadd.f32 %v693_v63, %v607_v54  ;;  %v2756_v4 = vpop.f32.mrb[30].mxu0  ;;  %2781 = vmatprep.mubr.bf16.mxu1 %v728_v57  ;;  %2826 = vmatpush3.bf16.msra.mxu1 %v3094_v22  ;;  %v3102_v22 = vld [vmem:[#allocation15 + $0x8] sm:$0xff]  }
 0x2c1   :  { %v705_v6 = vadd.f32 %v2756_v4, %v610_v56  ;;  %v696_v7 = vpop.f32.mrb[31].mxu0  ;;  %2782 = vmatmul.mubr.bf16.gmra.mrb[24].mxu1 %v729_v55  ;;  %v722_v9 = vmax.f32 %v702_v61, 0.0  ;;  %2827 = vmatprep.subr.bf16.mxu1 %v3095_v24 }
 0x2c2   :  { %v697_v8 = vadd.f32 %v696_v7, %v608_v60  ;;  %v720_v11 = vmax.f32 %v694_v3, 0.0 }
 0x2c3   :  { %v723_v10 = vmax.f32 %v705_v6, 0.0 }
 0x2c4   :  { %v721_v12 = vmax.f32 %v697_v8, 0.0  ;;  %2828 = vmatpush3.bf16.msra.mxu1 %v3095_v24  ;;  %v3104_v24 = vld [vmem:[#allocation15 + $0x10] sm:$0xff]  }
 0x2c5   :  { %v731_v13 = vpack.c.bf16 %v723_v10, %v722_v9  ;;  %2829 = vmatprep.subr.bf16.mxu1 %v3096_v25 }
 0x2c6   :  { %v730_v14 = vpack.c.bf16 %v721_v12, %v720_v11 }
 0x2c8   :  { %2785 = vmatprep.mubr.bf16.mxu1 %v730_v14  ;;  %2830 = vmatpush3.bf16.msra.mxu1 %v3096_v25  ;;  %v3099_v14 = vld [vmem:[#allocation16 + $0x38] sm:$0xff]  }
 0x2c9   :  { %2786 = vmatmul.mubr.bf16.gmra.mrb[28].mxu1 %v731_v13  ;;  %2831 = vmatprep.subr.bf16.mxu1 %v3097_v27  ;;  %v3098_v13 = vld [vmem:[#allocation16 + $0x30] sm:$0xff]   ;;  %v3106_v25 = vld [vmem:[#allocation15 + $0x18] sm:$0xff]  }
 0x2cc   :  { %2832 = vmatpush3.bf16.msra.mxu1 %v3097_v27  ;;  %v3108_v27 = vld [vmem:[#allocation15 + $0x20] sm:$0xff]  }
 0x2cd   :  { %2833 = vmatprep.subr.bf16.mxu1 %v3098_v13 }
 0x2d0   :  { %2834 = vmatpush3.bf16.msra.mxu1 %v3098_v13  ;;  %v3107_v13 = vld [vmem:[#allocation12 + $0x18] sm:$0xff]  }
 0x2d1   :  { %2835 = vmatprep.subr.bf16.mxu1 %v3099_v14 }
 0x2d4   :  { %2836 = vmatpush3.bf16.msra.mxu1 %v3099_v14 }
 0x2d5   :  { %2885 = vmatprep.subr.bf16.mxu1 %v3101_v19 }
 0x384   :  { %v2775_v28 = vpop.f32.mrb[16].mxu1 }
 0x385   :  { %v830_v29 = vpop.f32.mrb[17].mxu1 }
 0x386   :  { %v2776_v30 = vpop.f32.mrb[18].mxu1 }
 0x387   :  { %v894_v31 = vpack.c.bf16 %v2776_v30, %v2775_v28  ;;  %v833_v41 = vpop.f32.mrb[19].mxu1  ;;  %v3110_v28 = vld [vmem:[#allocation15 + $0x28] sm:$0xff]  }
 0x388   :  { %v893_v42 = vpack.c.bf16 %v833_v41, %v830_v29 }
 0x38a   :  { %2789 = vmatprep.subr.bf16.mxu0 %v893_v42 }
 0x38b   :  { %2790 = vmatpush3.bf16.msra.mxu0 %v893_v42 }
 0x38c   :  { %v2779_v46 = vpop.f32.mrb[20].mxu1  ;;  %2791 = vmatprep.subr.bf16.mxu0 %v894_v31 }
 0x38d   :  { %v846_v48 = vpop.f32.mrb[21].mxu1 }
 0x38e   :  { %v2780_v50 = vpop.f32.mrb[22].mxu1 }
 0x38f   :  { %v896_v53 = vpack.c.bf16 %v2780_v50, %v2779_v46  ;;  %v849_v55 = vpop.f32.mrb[23].mxu1  ;;  %2792 = vmatpush3.bf16.msra.mxu0 %v894_v31 }
 0x390   :  { %v895_v57 = vpack.c.bf16 %v849_v55, %v846_v48 }
 0x392   :  { %2793 = vmatprep.subr.bf16.mxu0 %v895_v57 }
 0x393   :  { %2794 = vmatpush3.bf16.msra.mxu0 %v895_v57 }
 0x394   :  { %v2783_v58 = vpop.f32.mrb[24].mxu1  ;;  %2795 = vmatprep.subr.bf16.mxu0 %v896_v53 }
 0x395   :  { %v862_v61 = vpop.f32.mrb[25].mxu1 }
 0x396   :  { %v2784_v63 = vpop.f32.mrb[26].mxu1 }
 0x397   :  { %v898_v3 = vpack.c.bf16 %v2784_v63, %v2783_v58  ;;  %v865_v4 = vpop.f32.mrb[27].mxu1  ;;  %2796 = vmatpush3.bf16.msra.mxu0 %v896_v53 }
 0x398   :  { %v897_v6 = vpack.c.bf16 %v865_v4, %v862_v61 }
 0x39a   :  { %2797 = vmatprep.subr.bf16.mxu0 %v897_v6 }
 0x39b   :  { %2798 = vmatpush3.bf16.msra.mxu0 %v897_v6 }
 0x39c   :  { %v2787_v7 = vpop.f32.mrb[28].mxu1  ;;  %2799 = vmatprep.subr.bf16.mxu0 %v898_v3 }
 0x39d   :  { %v878_v8 = vpop.f32.mrb[29].mxu1 }
 0x39e   :  { %v2788_v9 = vpop.f32.mrb[30].mxu1 }
 0x39f   :  { %v900_v10 = vpack.c.bf16 %v2788_v9, %v2787_v7  ;;  %v881_v11 = vpop.f32.mrb[31].mxu1  ;;  %2800 = vmatpush3.bf16.msra.mxu0 %v898_v3 }
 0x3a0   :  { %v899_v12 = vpack.c.bf16 %v881_v11, %v878_v8 }
 0x3a2   :  { %2801 = vmatprep.subr.bf16.mxu0 %v899_v12 }
 0x3a3   :  { %2802 = vmatpush3.bf16.msra.mxu0 %v899_v12 }
 0x3a4   :  { %2803 = vmatprep.subr.bf16.mxu0 %v900_v10 }
 0x3a7   :  { %2804 = vmatpush3.bf16.msra.mxu0 %v900_v10 }
 0x3a8   :  { %2853 = vmatprep.subr.bf16.mxu0 %v3100_v18 }
 0x3aa   :  { %2806 = vmatmul.mubr.bf16.vlgmr.msra.gmra.mrb[32].mxu0 %v3737_v32 }
 0x3ab   :  { %2809 = vmatprep.mubr.bf16.mxu0 %v3739_v33  ;;  %2854 = vmatpush3.bf16.msra.mxu0 %v3100_v18 }
 0x3ac   :  { %2855 = vmatprep.subr.bf16.mxu0 %v3102_v22 }
 0x3af   :  { %2856 = vmatpush3.bf16.msra.mxu0 %v3102_v22 }
 0x3b0   :  { %2857 = vmatprep.subr.bf16.mxu0 %v3104_v24 }
 0x3b2   :  { %2810 = vmatmul.mubr.bf16.gmra.mrb[36].mxu0 %v3743_v34 }
 0x3b3   :  { %2813 = vmatprep.mubr.bf16.mxu0 %v3745_v35  ;;  %2858 = vmatpush3.bf16.msra.mxu0 %v3104_v24 }
 0x3b4   :  { %2859 = vmatprep.subr.bf16.mxu0 %v3106_v25 }
 0x3b7   :  { %2860 = vmatpush3.bf16.msra.mxu0 %v3106_v25 }
 0x3b8   :  { %2861 = vmatprep.subr.bf16.mxu0 %v3108_v27 }
 0x3ba   :  { %2814 = vmatmul.mubr.bf16.gmra.mrb[40].mxu0 %v3749_v36 }
 0x3bb   :  { %2817 = vmatprep.mubr.bf16.mxu0 %v3751_v39  ;;  %2862 = vmatpush3.bf16.msra.mxu0 %v3108_v27 }
 0x3bc   :  { %2863 = vmatprep.subr.bf16.mxu0 %v3110_v28 }
 0x3bf   :  { %2864 = vmatpush3.bf16.msra.mxu0 %v3110_v28 }
 0x3c2   :  { %2818 = vmatmul.mubr.bf16.gmra.mrb[44].mxu0 %v3755_v40 }
 0x47d   :  { %v2807_v29 = vpop.f32.mrb[32].mxu0 }
 0x47e   :  { %v944_v30 = vadd.f32 %v2807_v29, %v597_v43  ;;  %v935_v31 = vpop.f32.mrb[33].mxu0 }
 0x47f   :  { %v936_v41 = vadd.f32 %v935_v31, %v595_v44  ;;  %v2808_v42 = vpop.f32.mrb[34].mxu0  ;;  %v3103_v44 = vld [vmem:[#allocation12 + $0x8] sm:$0xff]  }
 0x480   :  { %v947_v46 = vadd.f32 %v2808_v42, %v598_v45  ;;  %v938_v48 = vpop.f32.mrb[35].mxu0  ;;  %v1000_v53 = vmax.f32 %v944_v30, 0.0  ;;  %v3111_v30 = vld [vmem:[#allocation12 + $0x28] sm:$0xff]  }
 0x481   :  { %v939_v50 = vadd.f32 %v938_v48, %v596_v47  ;;  %v998_v57 = vmax.f32 %v936_v41, 0.0 }
 0x482   :  { %v1001_v55 = vmax.f32 %v947_v46, 0.0 }
 0x483   :  { %v999_v58 = vmax.f32 %v939_v50, 0.0 }
 0x484   :  { %v1015_v61 = vpack.c.bf16 %v1001_v55, %v1000_v53 }
 0x485   :  { %v1014_v63 = vpack.c.bf16 %v999_v58, %v998_v57  ;;  %v2811_v3 = vpop.f32.mrb[36].mxu0  ;;  %v3113_v57 = vld [vmem:[#allocation12 + $0x30] sm:$0xff]  }
 0x486   :  { %v960_v43 = vadd.f32 %v2811_v3, %v601_v59  ;;  %v951_v4 = vpop.f32.mrb[37].mxu0  ;;  %v3105_v59 = vld [vmem:[#allocation12 + $0x10] sm:$0xff]  }
 0x487   :  { %v952_v37 = vadd.f32 %v951_v4, %v599_v62  ;;  %v2812_v45 = vpop.f32.mrb[38].mxu0  ;;  %2837 = vmatprep.mubr.bf16.mxu1 %v1014_v63 }
 0x488   :  { %v963_v38 = vadd.f32 %v2812_v45, %v602_v0  ;;  %v954_v47 = vpop.f32.mrb[39].mxu0  ;;  %2838 = vmatmul.mubr.bf16.vlgmr.msra.gmra.mrb[32].mxu1 %v1015_v61  ;;  %v1004_v7 = vmax.f32 %v960_v43, 0.0 }
 0x489   :  { %v955_v6 = vadd.f32 %v954_v47, %v600_v5  ;;  %2886 = vmatpush3.bf16.msra.mxu1 %v3101_v19  ;;  %v1002_v9 = vmax.f32 %v952_v37, 0.0 }
 0x48a   :  { %v1005_v8 = vmax.f32 %v963_v38, 0.0  ;;  %2887 = vmatprep.subr.bf16.mxu1 %v3103_v44 }
 0x48b   :  { %v1003_v10 = vmax.f32 %v955_v6, 0.0 }
 0x48c   :  { %v1017_v11 = vpack.c.bf16 %v1005_v8, %v1004_v7 }
 0x48d   :  { %v1016_v12 = vpack.c.bf16 %v1003_v10, %v1002_v9  ;;  %v2815_v62 = vpop.f32.mrb[40].mxu0  ;;  %2888 = vmatpush3.bf16.msra.mxu1 %v3103_v44 }
 0x48e   :  { %v976_v51 = vadd.f32 %v2815_v62, %v605_v17  ;;  %v967_v0 = vpop.f32.mrb[41].mxu0  ;;  %2889 = vmatprep.subr.bf16.mxu1 %v3105_v59  ;;  %v3109_v17 = vld [vmem:[#allocation12 + $0x20] sm:$0xff]  }
 0x48f   :  { %v968_v52 = vadd.f32 %v967_v0, %v603_v21  ;;  %v2816_v5 = vpop.f32.mrb[42].mxu0  ;;  %2841 = vmatprep.mubr.bf16.mxu1 %v1016_v12 }
 0x490   :  { %v979_v14 = vadd.f32 %v2816_v5, %v606_v23  ;;  %v970_v18 = vpop.f32.mrb[43].mxu0  ;;  %2842 = vmatmul.mubr.bf16.gmra.mrb[36].mxu1 %v1017_v11  ;;  %v1008_v22 = vmax.f32 %v976_v51, 0.0 }
 0x491   :  { %v971_v19 = vadd.f32 %v970_v18, %v604_v26  ;;  %2890 = vmatpush3.bf16.msra.mxu1 %v3105_v59  ;;  %v1006_v25 = vmax.f32 %v968_v52, 0.0 }
 0x492   :  { %v1009_v24 = vmax.f32 %v979_v14, 0.0  ;;  %2891 = vmatprep.subr.bf16.mxu1 %v3107_v13 }
 0x493   :  { %v1007_v27 = vmax.f32 %v971_v19, 0.0 }
 0x494   :  { %v1019_v28 = vpack.c.bf16 %v1009_v24, %v1008_v22 }
 0x495   :  { %v1018_v29 = vpack.c.bf16 %v1007_v27, %v1006_v25  ;;  %v2819_v21 = vpop.f32.mrb[44].mxu0  ;;  %2892 = vmatpush3.bf16.msra.mxu1 %v3107_v13 }
 0x496   :  { %v992_v1 = vadd.f32 %v2819_v21, %v609_v49  ;;  %v983_v23 = vpop.f32.mrb[45].mxu0  ;;  %2893 = vmatprep.subr.bf16.mxu1 %v3109_v17 }
 0x497   :  { %v984_v2 = vadd.f32 %v983_v23, %v607_v54  ;;  %v2820_v26 = vpop.f32.mrb[46].mxu0  ;;  %2845 = vmatprep.mubr.bf16.mxu1 %v1018_v29  ;;  %v3112_v54 = vld [vmem:[#allocation15 + $0x30] sm:$0xff]  }
 0x498   :  { %v995_v31 = vadd.f32 %v2820_v26, %v610_v56  ;;  %v986_v41 = vpop.f32.mrb[47].mxu0  ;;  %2846 = vmatmul.mubr.bf16.gmra.mrb[40].mxu1 %v1019_v28  ;;  %v1012_v46 = vmax.f32 %v992_v1, 0.0  ;;  %2865 = vmatprep.subr.bf16.mxu0 %v3112_v54 }
 0x499   :  { %v987_v42 = vadd.f32 %v986_v41, %v608_v60  ;;  %2894 = vmatpush3.bf16.msra.mxu1 %v3109_v17  ;;  %v1010_v49 = vmax.f32 %v984_v2, 0.0  ;;  %2866 = vmatpush3.bf16.msra.mxu0 %v3112_v54 }
 0x49a   :  { %v1013_v48 = vmax.f32 %v995_v31, 0.0  ;;  %2895 = vmatprep.subr.bf16.mxu1 %v3111_v30  ;;  %2867 = vmatprep.subr.bf16.mxu0 %v3114_v15 }
 0x49b   :  { %v1011_v50 = vmax.f32 %v987_v42, 0.0 }
 0x49c   :  { %v1021_v53 = vpack.c.bf16 %v1013_v48, %v1012_v46 }
 0x49d   :  { %v1020_v55 = vpack.c.bf16 %v1011_v50, %v1010_v49  ;;  %2896 = vmatpush3.bf16.msra.mxu1 %v3111_v30  ;;  %2868 = vmatpush3.bf16.msra.mxu0 %v3114_v15 }
 0x49e   :  { %2897 = vmatprep.subr.bf16.mxu1 %v3113_v57 }
 0x49f   :  { %2849 = vmatprep.mubr.bf16.mxu1 %v1020_v55 }
 0x4a0   :  { %2850 = vmatmul.mubr.bf16.gmra.mrb[44].mxu1 %v1021_v53 }
 0x4a1   :  { %2898 = vmatpush3.bf16.msra.mxu1 %v3113_v57 }
 0x4a2   :  { %2899 = vmatprep.subr.bf16.mxu1 %v3115_v16 }
 0x4a5   :  { %2900 = vmatpush3.bf16.msra.mxu1 %v3115_v16 }
 0x55b   :  { %v2839_v56 = vpop.f32.mrb[32].mxu1 }
 0x55c   :  { %v1185_v60 = vmul.f32 0.33333334, %v2839_v56  ;;  %v1120_v58 = vpop.f32.mrb[33].mxu1  ;;  %v3116_v56 = vld [vmem:[#allocation13] sm:$0xff]  }
 0x55d   :  { %v1183_v61 = vmul.f32 0.33333334, %v1120_v58  ;;  %v2840_v63 = vpop.f32.mrb[34].mxu1  ;;  %2949 = vmatprep.subr.bf16.mxu1 %v3116_v56  ;;  %v3118_v58 = vld [vmem:[#allocation13 + $0x10] sm:$0xff]  }
 0x55e   :  { %v1186_v3 = vmul.f32 0.33333334, %v2840_v63  ;;  %v1123_v43 = vpop.f32.mrb[35].mxu1  ;;  %v1201_v44 = vmax.f32 %v1185_v60, 0.0  ;;  %v3117_v60 = vld [vmem:[#allocation13 + $0x8] sm:$0xff]   ;;  %v3120_v63 = vld [vmem:[#allocation13 + $0x20] sm:$0xff]  }
 0x55f   :  { %v1184_v4 = vmul.f32 0.33333334, %v1123_v43  ;;  %v1199_v45 = vmax.f32 %v1183_v61, 0.0  ;;  %v3119_v61 = vld [vmem:[#allocation13 + $0x18] sm:$0xff]  }
 0x560   :  { %v1202_v37 = vmax.f32 %v1186_v3, 0.0  ;;  %v3121_v3 = vld [vmem:[#allocation13 + $0x28] sm:$0xff]  }
 0x561   :  { %v1200_v38 = vmax.f32 %v1184_v4, 0.0 }
 0x562   :  { %v1216_v47 = vpack.c.bf16 %v1202_v37, %v1201_v44 }
 0x563   :  { %v1215_v6 = vpack.c.bf16 %v1200_v38, %v1199_v45  ;;  %v2843_v7 = vpop.f32.mrb[36].mxu1 }
 0x564   :  { %v1189_v8 = vmul.f32 0.33333334, %v2843_v7  ;;  %v1136_v59 = vpop.f32.mrb[37].mxu1 }
 0x565   :  { %v1187_v9 = vmul.f32 0.33333334, %v1136_v59  ;;  %v2844_v10 = vpop.f32.mrb[38].mxu1  ;;  %2869 = vmatprep.mubr.bf16.mxu0 %v1215_v6  ;;  %2901 = vmatprep.mubr.bf16.mxu1 %v1215_v6 }
 0x566   :  { %v1190_v11 = vmul.f32 0.33333334, %v2844_v10  ;;  %v1139_v12 = vpop.f32.mrb[39].mxu1  ;;  %2870 = vmatmul.mubr.bf16.vlgmr.msra.gmra.mrb[48].mxu0 %v1216_v47  ;;  %2902 = vmatmul.mubr.bf16.vlgmr.msra.gmra.mrb[48].mxu1 %v1216_v47  ;;  %v1205_v51 = vmax.f32 %v1189_v8, 0.0 }
 0x567   :  { %v1188_v62 = vmul.f32 0.33333334, %v1139_v12  ;;  %v1203_v13 = vmax.f32 %v1187_v9, 0.0  ;;  %2950 = vmatpush3.bf16.msra.mxu1 %v3116_v56 }
 0x568   :  { %v1206_v0 = vmax.f32 %v1190_v11, 0.0  ;;  %2951 = vmatprep.subr.bf16.mxu1 %v3117_v60 }
 0x569   :  { %v1204_v52 = vmax.f32 %v1188_v62, 0.0 }
 0x56a   :  { %v1218_v5 = vpack.c.bf16 %v1206_v0, %v1205_v51 }
 0x56b   :  { %v1217_v14 = vpack.c.bf16 %v1204_v52, %v1203_v13  ;;  %v2847_v18 = vpop.f32.mrb[40].mxu1  ;;  %2952 = vmatpush3.bf16.msra.mxu1 %v3117_v60 }
 0x56c   :  { %v1193_v19 = vmul.f32 0.33333334, %v2847_v18  ;;  %v1152_v22 = vpop.f32.mrb[41].mxu1  ;;  %2953 = vmatprep.subr.bf16.mxu1 %v3118_v58 }
 0x56d   :  { %v1191_v24 = vmul.f32 0.33333334, %v1152_v22  ;;  %v2848_v17 = vpop.f32.mrb[42].mxu1  ;;  %2873 = vmatprep.mubr.bf16.mxu0 %v1217_v14  ;;  %2905 = vmatprep.mubr.bf16.mxu1 %v1217_v14 }
 0x56e   :  { %v1194_v25 = vmul.f32 0.33333334, %v2848_v17  ;;  %v1155_v27 = vpop.f32.mrb[43].mxu1  ;;  %2874 = vmatmul.mubr.bf16.gmra.mrb[52].mxu0 %v1218_v5  ;;  %2906 = vmatmul.mubr.bf16.gmra.mrb[52].mxu1 %v1218_v5  ;;  %v1209_v29 = vmax.f32 %v1193_v19, 0.0 }
 0x56f   :  { %v1192_v28 = vmul.f32 0.33333334, %v1155_v27  ;;  %v1207_v1 = vmax.f32 %v1191_v24, 0.0  ;;  %2954 = vmatpush3.bf16.msra.mxu1 %v3118_v58 }
 0x570   :  { %v1210_v21 = vmax.f32 %v1194_v25, 0.0  ;;  %2955 = vmatprep.subr.bf16.mxu1 %v3119_v61 }
 0x571   :  { %v1208_v23 = vmax.f32 %v1192_v28, 0.0 }
 0x572   :  { %v1220_v30 = vpack.c.bf16 %v1210_v21, %v1209_v29 }
 0x573   :  { %v1219_v2 = vpack.c.bf16 %v1208_v23, %v1207_v1  ;;  %v2851_v26 = vpop.f32.mrb[44].mxu1  ;;  %2956 = vmatpush3.bf16.msra.mxu1 %v3119_v61 }
 0x574   :  { %v1197_v31 = vmul.f32 0.33333334, %v2851_v26  ;;  %v1168_v41 = vpop.f32.mrb[45].mxu1  ;;  %2957 = vmatprep.subr.bf16.mxu1 %v3120_v63 }
 0x575   :  { %v1195_v42 = vmul.f32 0.33333334, %v1168_v41  ;;  %v2852_v46 = vpop.f32.mrb[46].mxu1  ;;  %2877 = vmatprep.mubr.bf16.mxu0 %v1219_v2  ;;  %2909 = vmatprep.mubr.bf16.mxu1 %v1219_v2 }
 0x576   :  { %v1198_v48 = vmul.f32 0.33333334, %v2852_v46  ;;  %v1171_v49 = vpop.f32.mrb[47].mxu1  ;;  %2878 = vmatmul.mubr.bf16.gmra.mrb[56].mxu0 %v1220_v30  ;;  %2910 = vmatmul.mubr.bf16.gmra.mrb[56].mxu1 %v1220_v30  ;;  %v1213_v53 = vmax.f32 %v1197_v31, 0.0 }
 0x577   :  { %v1196_v50 = vmul.f32 0.33333334, %v1171_v49  ;;  %v1211_v54 = vmax.f32 %v1195_v42, 0.0  ;;  %2958 = vmatpush3.bf16.msra.mxu1 %v3120_v63 }
 0x578   :  { %v1214_v55 = vmax.f32 %v1198_v48, 0.0  ;;  %2959 = vmatprep.subr.bf16.mxu1 %v3121_v3 }
 0x579   :  { %v1212_v57 = vmax.f32 %v1196_v50, 0.0 }
 0x57a   :  { %v1222_v15 = vpack.c.bf16 %v1214_v55, %v1213_v53 }
 0x57b   :  { %v1221_v16 = vpack.c.bf16 %v1212_v57, %v1211_v54  ;;  %2960 = vmatpush3.bf16.msra.mxu1 %v3121_v3 }
 0x57d   :  { %2881 = vmatprep.mubr.bf16.mxu0 %v1221_v16  ;;  %2913 = vmatprep.mubr.bf16.mxu1 %v1221_v16 }
 0x57e   :  { %2882 = vmatmul.mubr.bf16.gmra.mrb[60].mxu0 %v1222_v15  ;;  %2914 = vmatmul.mubr.bf16.gmra.mrb[60].mxu1 %v1222_v15 }
 0x57f   :  { %2933 = vmatprep.mubr.bf16.mxu0 %v3734_v20  ;;  %v3850_v20 = vld [vmem:[%s4115_s9] ss:$0 sm:$0xff]  ;;  %s3472_s9 = smov [#allocation19]  }
 0x580   :  { %s2372_s25 = sshll.u32 %s3472_s9, 4  ;;  %s2373_s25 = int_to_ptr.vmem [resolvable:$true] %s2372_s25 }
 0x581   :  { %s3424_s4 = scalar_lea.vmem %s2373_s25, 2048  ;;  %p3429_p11 = scmp.lt.s32.totalorder %s2373_s25, %s2373_s25 }
 0x582   :  { %p3425_p10 = scmp.ne.s32.totalorder %s2373_s25, %s3424_s4  ;;  %p3430_p12 = scmp.lt.s32.totalorder %s3424_s4, %s3424_s4 }
 0x584   :  { %p3431_p13 = por %p3430_p12, %p3429_p11 }
 0x586   :  { %p3432_p0 = pnand %p3431_p13, %p3425_p10 }
 0x639   :  { %v2871_v43 = vpop.f32.mrb[48].mxu0  ;;  %v2903_v4 = vpop.f32.mrb[48].mxu1 }
 0x63a   :  { %v1328_v44 = vpop.f32.mrb[49].mxu0  ;;  %v1497_v37 = vpop.f32.mrb[49].mxu1  ;;  %v1337_v47 = vadd.f32 %v2871_v43, %v3850_v20 }
 0x63b   :  { %v2872_v45 = vpop.f32.mrb[50].mxu0  ;;  %v2904_v38 = vpop.f32.mrb[50].mxu1  ;;  %v1329_v9 = vadd.f32 %v3850_v20, %v1328_v44 }
 0x63c   :  { %v1340_v6 = vadd.f32 %v2872_v45, %v3850_v20  ;;  %v1561_v7 = vpack.c.bf16 %v2904_v38, %v2903_v4  ;;  %v1331_v8 = vpop.f32.mrb[51].mxu0  ;;  %v1500_v59 = vpop.f32.mrb[51].mxu1 }
 0x63d   :  { %v1332_v10 = vadd.f32 %v3850_v20, %v1331_v8  ;;  %v1560_v11 = vpack.c.bf16 %v1500_v59, %v1497_v37  ;;  %v3123_v8 = vld [vmem:[#allocation13 + $0x38] sm:$0xff]  }
 0x63e   :  { %v3856_v12 = vpack.c.bf16 %v1340_v6, %v1337_v47 }
 0x63f   :  { %v3858_v62 = vpack.c.bf16 %v1332_v10, %v1329_v9  ;;  %2917 = vmatprep.subr.bf16.mxu0 %v1560_v11 }
 0x640   :  { %2918 = vmatpush3.bf16.msra.mxu0 %v1560_v11 }
 0x641   :  { %v2875_v51 = vpop.f32.mrb[52].mxu0  ;;  %v2907_v0 = vpop.f32.mrb[52].mxu1  ;;  %2919 = vmatprep.subr.bf16.mxu0 %v1561_v7  ;;  %v1569_v9 = vunpack.c.h.bf16 %v3858_v62 }
 0x642   :  { %v1344_v13 = vpop.f32.mrb[53].mxu0  ;;  %v1513_v52 = vpop.f32.mrb[53].mxu1  ;;  %v1353_v18 = vadd.f32 %v2875_v51, %v3850_v20 }
 0x643   :  { %v2876_v5 = vpop.f32.mrb[54].mxu0  ;;  %v2908_v14 = vpop.f32.mrb[54].mxu1  ;;  %v1345_v25 = vadd.f32 %v3850_v20, %v1344_v13 }
 0x644   :  { %v1356_v19 = vadd.f32 %v2876_v5, %v3850_v20  ;;  %v1563_v22 = vpack.c.bf16 %v2908_v14, %v2907_v0  ;;  %v1347_v24 = vpop.f32.mrb[55].mxu0  ;;  %v1516_v17 = vpop.f32.mrb[55].mxu1  ;;  %2920 = vmatpush3.bf16.msra.mxu0 %v1561_v7  ;;  %v3122_v7 = vld [vmem:[#allocation13 + $0x30] sm:$0xff]  }
 0x645   :  { %v1348_v27 = vadd.f32 %v3850_v20, %v1347_v24  ;;  %v1562_v28 = vpack.c.bf16 %v1516_v17, %v1513_v52  ;;  %2961 = vmatprep.subr.bf16.mxu1 %v3122_v7 }
 0x646   :  { %v3864_v29 = vpack.c.bf16 %v1356_v19, %v1353_v18  ;;  %2962 = vmatpush3.bf16.msra.mxu1 %v3122_v7 }
 0x647   :  { %v3866_v21 = vpack.c.bf16 %v1348_v27, %v1345_v25  ;;  %2921 = vmatprep.subr.bf16.mxu0 %v1562_v28  ;;  %2963 = vmatprep.subr.bf16.mxu1 %v3123_v8 }
 0x648   :  { %2922 = vmatpush3.bf16.msra.mxu0 %v1562_v28  ;;  %v1574_v18 = vunpack.c.l.bf16 %v3864_v29  ;;  %v1575_v27 = vunpack.c.h.bf16 %v3864_v29 }
 0x649   :  { %v2879_v1 = vpop.f32.mrb[56].mxu0  ;;  %v2911_v23 = vpop.f32.mrb[56].mxu1  ;;  %2923 = vmatprep.subr.bf16.mxu0 %v1563_v22  ;;  %v1572_v24 = vunpack.c.l.bf16 %v3866_v21 }
 0x64a   :  { %v1360_v30 = vpop.f32.mrb[57].mxu0  ;;  %v1529_v2 = vpop.f32.mrb[57].mxu1  ;;  %v1369_v41 = vadd.f32 %v2879_v1, %v3850_v20  ;;  %2964 = vmatpush3.bf16.msra.mxu1 %v3123_v8 }
 0x64b   :  { %v2880_v26 = vpop.f32.mrb[58].mxu0  ;;  %v2912_v31 = vpop.f32.mrb[58].mxu1  ;;  %v1361_v50 = vadd.f32 %v3850_v20, %v1360_v30 }
 0x64c   :  { %v1372_v42 = vadd.f32 %v2880_v26, %v3850_v20  ;;  %v1565_v46 = vpack.c.bf16 %v2912_v31, %v2911_v23  ;;  %v1363_v48 = vpop.f32.mrb[59].mxu0  ;;  %v1532_v49 = vpop.f32.mrb[59].mxu1  ;;  %2924 = vmatpush3.bf16.msra.mxu0 %v1563_v22  ;;  %v1573_v23 = vunpack.c.h.bf16 %v3866_v21 }
 0x64d   :  { %v1364_v53 = vadd.f32 %v3850_v20, %v1363_v48  ;;  %v1564_v55 = vpack.c.bf16 %v1532_v49, %v1529_v2 }
 0x64e   :  { %v3872_v54 = vpack.c.bf16 %v1372_v42, %v1369_v41 }
 0x64f   :  { %v3874_v57 = vpack.c.bf16 %v1364_v53, %v1361_v50  ;;  %2925 = vmatprep.subr.bf16.mxu0 %v1564_v55 }
 0x650   :  { %2926 = vmatpush3.bf16.msra.mxu0 %v1564_v55  ;;  %v1578_v49 = vunpack.c.l.bf16 %v3872_v54 }
 0x651   :  { %v2883_v15 = vpop.f32.mrb[60].mxu0  ;;  %v2915_v16 = vpop.f32.mrb[60].mxu1  ;;  %2927 = vmatprep.subr.bf16.mxu0 %v1565_v46  ;;  %v1576_v55 = vunpack.c.l.bf16 %v3874_v57 }
 0x652   :  { %v1376_v56 = vpop.f32.mrb[61].mxu0  ;;  %v1545_v60 = vpop.f32.mrb[61].mxu1  ;;  %v1385_v63 = vadd.f32 %v2883_v15, %v3850_v20 }
 0x653   :  { %v2884_v58 = vpop.f32.mrb[62].mxu0  ;;  %v2916_v61 = vpop.f32.mrb[62].mxu1  ;;  %v1377_v37 = vadd.f32 %v3850_v20, %v1376_v56  ;;  %v1579_v56 = vunpack.c.h.bf16 %v3872_v54 }
 0x654   :  { %v1388_v3 = vadd.f32 %v2884_v58, %v3850_v20  ;;  %v1567_v43 = vpack.c.bf16 %v2916_v61, %v2915_v16  ;;  %v1379_v4 = vpop.f32.mrb[63].mxu0  ;;  %v1548_v44 = vpop.f32.mrb[63].mxu1  ;;  %2928 = vmatpush3.bf16.msra.mxu0 %v1565_v46  ;;  %v1577_v61 = vunpack.c.h.bf16 %v3874_v57 }
 0x655   :  { %v1380_v45 = vadd.f32 %v3850_v20, %v1379_v4  ;;  %v1566_v38 = vpack.c.bf16 %v1548_v44, %v1545_v60  ;;  %v3196_v20 = vld [vmem:[#allocation2] sm:$0xff] }
 0x656   :  { %v3880_v47 = vpack.c.bf16 %v1388_v3, %v1385_v63 }
 0x657   :  { %v3882_v6 = vpack.c.bf16 %v1380_v45, %v1377_v37  ;;  %2929 = vmatprep.subr.bf16.mxu0 %v1566_v38 }
 0x658   :  { %2930 = vmatpush3.bf16.msra.mxu0 %v1566_v38 }
 0x659   :  { %2931 = vmatprep.subr.bf16.mxu0 %v1567_v43 }
 0x65c   :  { %2932 = vmatpush3.bf16.msra.mxu0 %v1567_v43 }
 0x65f   :  { %2934 = vmatmul.mubr.bf16.vlgmr.msra.gmra.mrb[64].mxu0 %v3737_v32  ;;  %v1570_v32 = vunpack.c.l.bf16 %v3856_v12 }
 0x660   :  { %2937 = vmatprep.mubr.bf16.mxu0 %v3739_v33 }
 0x667   :  { %2938 = vmatmul.mubr.bf16.gmra.mrb[68].mxu0 %v3743_v34  ;;  %v1568_v34 = vunpack.c.l.bf16 %v3858_v62 }
 0x668   :  { %2941 = vmatprep.mubr.bf16.mxu0 %v3745_v35 }
 0x66f   :  { %2942 = vmatmul.mubr.bf16.gmra.mrb[72].mxu0 %v3749_v36 }
 0x670   :  { %2945 = vmatprep.mubr.bf16.mxu0 %v3751_v39  ;;  %v1571_v39 = vunpack.c.h.bf16 %v3856_v12 }
 0x677   :  { %2946 = vmatmul.mubr.bf16.gmra.mrb[76].mxu0 %v3755_v40 }
 0x678   :  { %2997 = vmatprep.mubr.bf16.mxu0 %v3196_v20  ;;  %v1582_v20 = vunpack.c.l.bf16 %v3880_v47 }
 0x732   :  { %v2935_v33 = vpop.f32.mrb[64].mxu0 }
 0x733   :  { %v1627_v35 = vadd.f32 %v2935_v33, %v1570_v32  ;;  %v1618_v36 = vpop.f32.mrb[65].mxu0  ;;  %v1580_v33 = vunpack.c.l.bf16 %v3882_v6 }
 0x734   :  { %v1619_v40 = vadd.f32 %v1618_v36, %v1568_v34  ;;  %v2936_v59 = vpop.f32.mrb[66].mxu0 }
 0x735   :  { %v1630_v10 = vadd.f32 %v2936_v59, %v1571_v39  ;;  %v1621_v11 = vpop.f32.mrb[67].mxu0  ;;  %v1683_v0 = vmax.f32 %v1627_v35, 0.0 }
 0x736   :  { %v1622_v51 = vadd.f32 %v1621_v11, %v1569_v9  ;;  %v1681_v52 = vmax.f32 %v1619_v40, 0.0  ;;  %v1583_v40 = vunpack.c.h.bf16 %v3880_v47  ;;  %v1581_v11 = vunpack.c.h.bf16 %v3882_v6 }
 0x737   :  { %v1684_v13 = vmax.f32 %v1630_v10, 0.0 }
 0x738   :  { %v1682_v5 = vmax.f32 %v1622_v51, 0.0 }
 0x739   :  { %v1698_v14 = vpack.c.bf16 %v1684_v13, %v1683_v0 }
 0x73a   :  { %v1697_v19 = vpack.c.bf16 %v1682_v5, %v1681_v52  ;;  %v2939_v22 = vpop.f32.mrb[68].mxu0 }
 0x73b   :  { %v1643_v17 = vadd.f32 %v2939_v22, %v1574_v18  ;;  %v1634_v25 = vpop.f32.mrb[69].mxu0 }
 0x73c   :  { %v1635_v28 = vadd.f32 %v1634_v25, %v1572_v24  ;;  %v2940_v1 = vpop.f32.mrb[70].mxu0  ;;  %2965 = vmatprep.mubr.bf16.mxu1 %v1697_v19  ;;  %v3124_v25 = vld [vmem:[#allocation18] sm:$0xff]  }
 0x73d   :  { %v1646_v30 = vadd.f32 %v2940_v1, %v1575_v27  ;;  %v1637_v2 = vpop.f32.mrb[71].mxu0  ;;  %2966 = vmatmul.mubr.bf16.vlgmr.msra.gmra.mrb[64].mxu1 %v1698_v14  ;;  %v1687_v31 = vmax.f32 %v1643_v17, 0.0  ;;  %3013 = vmatprep.subr.bf16.mxu1 %v3124_v25  ;;  %v3126_v1 = vld [vmem:[#allocation18 + $0x10] sm:$0xff]  }
 0x73e   :  { %v1638_v26 = vadd.f32 %v1637_v2, %v1573_v23  ;;  %v1685_v42 = vmax.f32 %v1635_v28, 0.0  ;;  %v3125_v28 = vld [vmem:[#allocation18 + $0x8] sm:$0xff]   ;;  %3014 = vmatpush3.bf16.msra.mxu1 %v3124_v25  ;;  %v3128_v2 = vld [vmem:[#allocation18 + $0x20] sm:$0xff]  }
 0x73f   :  { %v1688_v41 = vmax.f32 %v1646_v30, 0.0  ;;  %3015 = vmatprep.subr.bf16.mxu1 %v3125_v28  ;;  %v3127_v30 = vld [vmem:[#allocation18 + $0x18] sm:$0xff]  }
 0x740   :  { %v1686_v46 = vmax.f32 %v1638_v26, 0.0  ;;  %v3129_v26 = vld [vmem:[#allocation18 + $0x28] sm:$0xff]  }
 0x741   :  { %v1700_v48 = vpack.c.bf16 %v1688_v41, %v1687_v31 }
 0x742   :  { %v1699_v50 = vpack.c.bf16 %v1686_v46, %v1685_v42  ;;  %v2943_v53 = vpop.f32.mrb[72].mxu0  ;;  %3016 = vmatpush3.bf16.msra.mxu1 %v3125_v28 }
 0x743   :  { %v1659_v15 = vadd.f32 %v2943_v53, %v1578_v49  ;;  %v1650_v16 = vpop.f32.mrb[73].mxu0  ;;  %3017 = vmatprep.subr.bf16.mxu1 %v3126_v1 }
 0x744   :  { %v1651_v60 = vadd.f32 %v1650_v16, %v1576_v55  ;;  %v2944_v58 = vpop.f32.mrb[74].mxu0  ;;  %2969 = vmatprep.mubr.bf16.mxu1 %v1699_v50 }
 0x745   :  { %v1662_v63 = vadd.f32 %v2944_v58, %v1579_v56  ;;  %v1653_v3 = vpop.f32.mrb[75].mxu0  ;;  %2970 = vmatmul.mubr.bf16.gmra.mrb[68].mxu1 %v1700_v48  ;;  %v1691_v4 = vmax.f32 %v1659_v15, 0.0 }
 0x746   :  { %v1654_v43 = vadd.f32 %v1653_v3, %v1577_v61  ;;  %v1689_v37 = vmax.f32 %v1651_v60, 0.0  ;;  %3018 = vmatpush3.bf16.msra.mxu1 %v3126_v1 }
 0x747   :  { %v1692_v44 = vmax.f32 %v1662_v63, 0.0  ;;  %3019 = vmatprep.subr.bf16.mxu1 %v3127_v30 }
 0x748   :  { %v1690_v45 = vmax.f32 %v1654_v43, 0.0 }
 0x749   :  { %v1702_v38 = vpack.c.bf16 %v1692_v44, %v1691_v4 }
 0x74a   :  { %v1701_v7 = vpack.c.bf16 %v1690_v45, %v1689_v37  ;;  %v2947_v8 = vpop.f32.mrb[76].mxu0  ;;  %3020 = vmatpush3.bf16.msra.mxu1 %v3127_v30 }
 0x74b   :  { %v1675_v35 = vadd.f32 %v2947_v8, %v1582_v20  ;;  %v1666_v36 = vpop.f32.mrb[77].mxu0  ;;  %3021 = vmatprep.subr.bf16.mxu1 %v3128_v2 }
 0x74c   :  { %v1667_v59 = vadd.f32 %v1666_v36, %v1580_v33  ;;  %v2948_v10 = vpop.f32.mrb[78].mxu0  ;;  %2973 = vmatprep.mubr.bf16.mxu1 %v1701_v7 }
 0x74d   :  { %v1678_v51 = vadd.f32 %v2948_v10, %v1583_v40  ;;  %v1669_v0 = vpop.f32.mrb[79].mxu0  ;;  %2974 = vmatmul.mubr.bf16.gmra.mrb[72].mxu1 %v1702_v38  ;;  %v1695_v52 = vmax.f32 %v1675_v35, 0.0  ;;  %v3197_v10 = vld [vmem:[#allocation2 + $0x8] sm:$0xff] }
 0x74e   :  { %v1670_v13 = vadd.f32 %v1669_v0, %v1581_v11  ;;  %v1693_v14 = vmax.f32 %v1667_v59, 0.0  ;;  %3022 = vmatpush3.bf16.msra.mxu1 %v3128_v2  ;;  %v3199_v0 = vld [vmem:[#allocation2 + $0x18] sm:$0xff] }
 0x74f   :  { %v1696_v5 = vmax.f32 %v1678_v51, 0.0  ;;  %3023 = vmatprep.subr.bf16.mxu1 %v3129_v26  ;;  %v3198_v51 = vld [vmem:[#allocation2 + $0x10] sm:$0xff] }
 0x750   :  { %v1694_v19 = vmax.f32 %v1670_v13, 0.0  ;;  %v3200_v13 = vld [vmem:[#allocation2 + $0x20] sm:$0xff] }
 0x751   :  { %v1704_v22 = vpack.c.bf16 %v1696_v5, %v1695_v52  ;;  %v3201_v52 = vld [vmem:[#allocation2 + $0x28] sm:$0xff]  ;;  %v3202_v5 = vld [vmem:[#allocation2 + $0x30] sm:$0xff] }
 0x752   :  { %v1703_v17 = vpack.c.bf16 %v1694_v19, %v1693_v14  ;;  %3024 = vmatpush3.bf16.msra.mxu1 %v3129_v26  ;;  %v3203_v14 = vld [vmem:[#allocation2 + $0x38] sm:$0xff]  ;;  %v3130_v19 = vld [vmem:[#allocation18 + $0x30] sm:$0xff]  }
 0x753   :  { %3025 = vmatprep.subr.bf16.mxu1 %v3130_v19 }
 0x754   :  { %2977 = vmatprep.mubr.bf16.mxu1 %v1703_v17 }
 0x755   :  { %2978 = vmatmul.mubr.bf16.gmra.mrb[76].mxu1 %v1704_v22  ;;  %v3131_v22 = vld [vmem:[#allocation18 + $0x38] sm:$0xff]  }
 0x756   :  { %3026 = vmatpush3.bf16.msra.mxu1 %v3130_v19 }
 0x757   :  { %3027 = vmatprep.subr.bf16.mxu1 %v3131_v22 }
 0x75a   :  { %3028 = vmatpush3.bf16.msra.mxu1 %v3131_v22 }
 0x810   :  { %v2967_v31 = vpop.f32.mrb[64].mxu1 }
 0x811   :  { %v1803_v41 = vpop.f32.mrb[65].mxu1 }
 0x812   :  { %v2968_v42 = vpop.f32.mrb[66].mxu1 }
 0x813   :  { %v1867_v46 = vpack.c.bf16 %v2968_v42, %v2967_v31  ;;  %v1806_v48 = vpop.f32.mrb[67].mxu1 }
 0x814   :  { %v1866_v50 = vpack.c.bf16 %v1806_v48, %v1803_v41 }
 0x816   :  { %2981 = vmatprep.subr.bf16.mxu0 %v1866_v50 }
 0x817   :  { %2982 = vmatpush3.bf16.msra.mxu0 %v1866_v50 }
 0x818   :  { %v2971_v53 = vpop.f32.mrb[68].mxu1  ;;  %2983 = vmatprep.subr.bf16.mxu0 %v1867_v46 }
 0x819   :  { %v1819_v15 = vpop.f32.mrb[69].mxu1 }
 0x81a   :  { %v2972_v16 = vpop.f32.mrb[70].mxu1 }
 0x81b   :  { %v1869_v60 = vpack.c.bf16 %v2972_v16, %v2971_v53  ;;  %v1822_v58 = vpop.f32.mrb[71].mxu1  ;;  %2984 = vmatpush3.bf16.msra.mxu0 %v1867_v46 }
 0x81c   :  { %v1868_v63 = vpack.c.bf16 %v1822_v58, %v1819_v15 }
 0x81e   :  { %2985 = vmatprep.subr.bf16.mxu0 %v1868_v63 }
 0x81f   :  { %2986 = vmatpush3.bf16.msra.mxu0 %v1868_v63 }
 0x820   :  { %v2975_v3 = vpop.f32.mrb[72].mxu1  ;;  %2987 = vmatprep.subr.bf16.mxu0 %v1869_v60 }
 0x821   :  { %v1835_v43 = vpop.f32.mrb[73].mxu1 }
 0x822   :  { %v2976_v4 = vpop.f32.mrb[74].mxu1 }
 0x823   :  { %v1871_v44 = vpack.c.bf16 %v2976_v4, %v2975_v3  ;;  %v1838_v37 = vpop.f32.mrb[75].mxu1  ;;  %2988 = vmatpush3.bf16.msra.mxu0 %v1869_v60 }
 0x824   :  { %v1870_v45 = vpack.c.bf16 %v1838_v37, %v1835_v43 }
 0x826   :  { %2989 = vmatprep.subr.bf16.mxu0 %v1870_v45 }
 0x827   :  { %2990 = vmatpush3.bf16.msra.mxu0 %v1870_v45 }
 0x828   :  { %v2979_v38 = vpop.f32.mrb[76].mxu1  ;;  %2991 = vmatprep.subr.bf16.mxu0 %v1871_v44 }
 0x829   :  { %v1851_v7 = vpop.f32.mrb[77].mxu1 }
 0x82a   :  { %v2980_v8 = vpop.f32.mrb[78].mxu1 }
 0x82b   :  { %v1873_v35 = vpack.c.bf16 %v2980_v8, %v2979_v38  ;;  %v1854_v36 = vpop.f32.mrb[79].mxu1  ;;  %2992 = vmatpush3.bf16.msra.mxu0 %v1871_v44 }
 0x82c   :  { %v1872_v59 = vpack.c.bf16 %v1854_v36, %v1851_v7 }
 0x82e   :  { %2993 = vmatprep.subr.bf16.mxu0 %v1872_v59 }
 0x82f   :  { %2994 = vmatpush3.bf16.msra.mxu0 %v1872_v59 }
 0x830   :  { %2995 = vmatprep.subr.bf16.mxu0 %v1873_v35 }
 0x833   :  { %2996 = vmatpush3.bf16.msra.mxu0 %v1873_v35 }
 0x836   :  { %2998 = vmatmul.mubr.bf16.vlgmr.msra.gmra.mrb[80].mxu0 %v3197_v10 }
 0x837   :  { %3001 = vmatprep.mubr.bf16.mxu0 %v3198_v51 }
 0x83e   :  { %3002 = vmatmul.mubr.bf16.gmra.mrb[84].mxu0 %v3199_v0 }
 0x83f   :  { %3005 = vmatprep.mubr.bf16.mxu0 %v3200_v13 }
 0x846   :  { %3006 = vmatmul.mubr.bf16.gmra.mrb[88].mxu0 %v3201_v52 }
 0x847   :  { %3009 = vmatprep.mubr.bf16.mxu0 %v3202_v5 }
 0x84e   :  { %3010 = vmatmul.mubr.bf16.gmra.mrb[92].mxu0 %v3203_v14  ;;  %v2172_v14 = vlaneseq }
 0x909   :  { %v2999_v17 = vpop.f32.mrb[80].mxu0 }
 0x90a   :  { %v1917_v25 = vadd.f32 %v2999_v17, %v1570_v32  ;;  %v1908_v28 = vpop.f32.mrb[81].mxu0 }
 0x90b   :  { %v1909_v1 = vadd.f32 %v1908_v28, %v1568_v34  ;;  %v3000_v30 = vpop.f32.mrb[82].mxu0 }
 0x90c   :  { %v1920_v2 = vadd.f32 %v3000_v30, %v1571_v39  ;;  %v1911_v26 = vpop.f32.mrb[83].mxu0  ;;  %v1973_v41 = vmax.f32 %v1917_v25, 0.0 }
 0x90d   :  { %v1912_v31 = vadd.f32 %v1911_v26, %v1569_v9  ;;  %v1971_v46 = vmax.f32 %v1909_v1, 0.0 }
 0x90e   :  { %v1974_v42 = vmax.f32 %v1920_v2, 0.0 }
 0x90f   :  { %v1972_v48 = vmax.f32 %v1912_v31, 0.0 }
 0x910   :  { %v1988_v50 = vpack.c.bf16 %v1974_v42, %v1973_v41 }
 0x911   :  { %v1987_v53 = vpack.c.bf16 %v1972_v48, %v1971_v46  ;;  %v3003_v15 = vpop.f32.mrb[84].mxu0 }
 0x912   :  { %v1933_v32 = vadd.f32 %v3003_v15, %v1574_v18  ;;  %v1924_v16 = vpop.f32.mrb[85].mxu0 }
 0x913   :  { %v1925_v34 = vadd.f32 %v1924_v16, %v1572_v24  ;;  %v3004_v12 = vpop.f32.mrb[86].mxu0  ;;  %3029 = vmatprep.mubr.bf16.mxu1 %v1987_v53 }
 0x914   :  { %v1936_v62 = vadd.f32 %v3004_v12, %v1575_v27  ;;  %v1927_v39 = vpop.f32.mrb[87].mxu0  ;;  %3030 = vmatmul.mubr.bf16.vlgmr.msra.gmra.mrb[80].mxu1 %v1988_v50  ;;  %v1977_v60 = vmax.f32 %v1933_v32, 0.0 }
 0x915   :  { %v1928_v9 = vadd.f32 %v1927_v39, %v1573_v23  ;;  %v1975_v63 = vmax.f32 %v1925_v34, 0.0 }
 0x916   :  { %v1978_v58 = vmax.f32 %v1936_v62, 0.0 }
 0x917   :  { %v1976_v3 = vmax.f32 %v1928_v9, 0.0 }
 0x918   :  { %v1990_v43 = vpack.c.bf16 %v1978_v58, %v1977_v60 }
 0x919   :  { %v1989_v18 = vpack.c.bf16 %v1976_v3, %v1975_v63  ;;  %v3007_v4 = vpop.f32.mrb[88].mxu0 }
 0x91a   :  { %v1949_v24 = vadd.f32 %v3007_v4, %v1578_v49  ;;  %v1940_v44 = vpop.f32.mrb[89].mxu0 }
 0x91b   :  { %v1941_v29 = vadd.f32 %v1940_v44, %v1576_v55  ;;  %v3008_v27 = vpop.f32.mrb[90].mxu0  ;;  %3033 = vmatprep.mubr.bf16.mxu1 %v1989_v18 }
 0x91c   :  { %v1952_v21 = vadd.f32 %v3008_v27, %v1579_v56  ;;  %v1943_v23 = vpop.f32.mrb[91].mxu0  ;;  %3034 = vmatmul.mubr.bf16.gmra.mrb[84].mxu1 %v1990_v43  ;;  %v1981_v45 = vmax.f32 %v1949_v24, 0.0 }
 0x91d   :  { %v1944_v37 = vadd.f32 %v1943_v23, %v1577_v61  ;;  %v1979_v7 = vmax.f32 %v1941_v29, 0.0 }
 0x91e   :  { %v1982_v38 = vmax.f32 %v1952_v21, 0.0 }
 0x91f   :  { %v1980_v8 = vmax.f32 %v1944_v37, 0.0 }
 0x920   :  { %v1992_v35 = vpack.c.bf16 %v1982_v38, %v1981_v45 }
 0x921   :  { %v1991_v49 = vpack.c.bf16 %v1980_v8, %v1979_v7  ;;  %v3011_v36 = vpop.f32.mrb[92].mxu0 }
 0x922   :  { %v1965_v55 = vadd.f32 %v3011_v36, %v1582_v20  ;;  %v1956_v59 = vpop.f32.mrb[93].mxu0 }
 0x923   :  { %v1957_v54 = vadd.f32 %v1956_v59, %v1580_v33  ;;  %v3012_v56 = vpop.f32.mrb[94].mxu0  ;;  %3037 = vmatprep.mubr.bf16.mxu1 %v1991_v49  ;;  %v3971_v33 = vand.u32 127, %v2172_v14 }
 0x924   :  { %v1968_v57 = vadd.f32 %v3012_v56, %v1583_v40  ;;  %v1959_v61 = vpop.f32.mrb[95].mxu0  ;;  %3038 = vmatmul.mubr.bf16.gmra.mrb[88].mxu1 %v1992_v35  ;;  %v1985_v51 = vmax.f32 %v1965_v55, 0.0 }
 0x925   :  { %v1960_v10 = vadd.f32 %v1959_v61, %v1581_v11  ;;  %v1983_v13 = vmax.f32 %v1957_v54, 0.0  ;;  %vm2174_vm0 = vcmp.lt.s32.totalorder %v3971_v33, 2 }
 0x926   :  { %v1986_v0 = vmax.f32 %v1968_v57, 0.0 }
 0x927   :  { %v1984_v52 = vmax.f32 %v1960_v10, 0.0 }
 0x928   :  { %v1994_v5 = vpack.c.bf16 %v1986_v0, %v1985_v51 }
 0x929   :  { %v1993_v20 = vpack.c.bf16 %v1984_v52, %v1983_v13 }
 0x92b   :  { %3041 = vmatprep.mubr.bf16.mxu1 %v1993_v20 }
 0x92c   :  { %3042 = vmatmul.mubr.bf16.gmra.mrb[92].mxu1 %v1994_v5 }
 0x9e7   :  { %v3031_v19 = vpop.f32.mrb[80].mxu1 }
 0x9e8   :  { %v2158_v47 = vmul.f32 0.33333334, %v3031_v19  ;;  %v2093_v40 = vpop.f32.mrb[81].mxu1 }
 0x9e9   :  { %v2156_v22 = vmul.f32 0.33333334, %v2093_v40  ;;  %v3032_v17 = vpop.f32.mrb[82].mxu1 }
 0x9ea   :  { %v2159_v6 = vmul.f32 0.33333334, %v3032_v17  ;;  %v2096_v11 = vpop.f32.mrb[83].mxu1  ;;  %v2177_v25 = vsel %vm2174_vm0, %v2158_v47, -1e+30 }
 0x9eb   :  { %v2157_v28 = vmul.f32 0.33333334, %v2096_v11  ;;  %2195 = vmax.xlane.f32.xlu1 %v2177_v25  ;;  %v2175_v1 = vsel %vm2174_vm0, %v2156_v22, -1e+30 }
 0x9ec   :  { %2191 = vmax.xlane.f32.xlu0 %v2175_v1  ;;  %v2178_v30 = vsel %vm2174_vm0, %v2159_v6, -1e+30 }
 0x9ed   :  { %v2176_v26 = vsel %vm2174_vm0, %v2157_v28, -1e+30 }
 0x9ef   :  { %2197 = vmax.xlane.f32.xlu1 %v2178_v30  ;;  %v3035_v2 = vpop.f32.mrb[84].mxu1 }
 0x9f0   :  { %v2162_v31 = vmul.f32 0.33333334, %v3035_v2  ;;  %2193 = vmax.xlane.f32.xlu0 %v2176_v26  ;;  %v2109_v41 = vpop.f32.mrb[85].mxu1 }
 0x9f1   :  { %v3036_v42 = vpop.f32.mrb[86].mxu1  ;;  %v2160_v53 = vmul.f32 0.33333334, %v2109_v41 }
 0x9f2   :  { %v2163_v46 = vmul.f32 0.33333334, %v3036_v42  ;;  %v2112_v48 = vpop.f32.mrb[87].mxu1  ;;  %v2181_v50 = vsel %vm2174_vm0, %v2162_v31, -1e+30 }
 0x9f3   :  { %v2161_v15 = vmul.f32 0.33333334, %v2112_v48  ;;  %v2179_v34 = vsel %vm2174_vm0, %v2160_v53, -1e+30 }
 0x9f4   :  { %2203 = vmax.xlane.f32.xlu0 %v2181_v50  ;;  %v2182_v32 = vsel %vm2174_vm0, %v2163_v46, -1e+30 }
 0x9f5   :  { %2205 = vmax.xlane.f32.xlu1 %v2182_v32  ;;  %v2180_v39 = vsel %vm2174_vm0, %v2161_v15, -1e+30 }
 0x9f7   :  { %v3039_v16 = vpop.f32.mrb[88].mxu1 }
 0x9f8   :  { %v2166_v12 = vmul.f32 0.33333334, %v3039_v16  ;;  %2199 = vmax.xlane.f32.xlu0 %v2179_v34  ;;  %v2125_v62 = vpop.f32.mrb[89].mxu1 }
 0x9f9   :  { %2201 = vmax.xlane.f32.xlu1 %v2180_v39  ;;  %v3040_v9 = vpop.f32.mrb[90].mxu1  ;;  %v2164_v3 = vmul.f32 0.33333334, %v2125_v62 }
 0x9fa   :  { %v2167_v60 = vmul.f32 0.33333334, %v3040_v9  ;;  %v2128_v58 = vpop.f32.mrb[91].mxu1  ;;  %v2185_v63 = vsel %vm2174_vm0, %v2166_v12, -1e+30 }
 0x9fb   :  { %v2165_v43 = vmul.f32 0.33333334, %v2128_v58  ;;  %v3996_v24 = vsel %vm2174_vm0, %v2164_v3, -1e+30 }
 0x9fc   :  { %2211 = vmax.xlane.f32.xlu0 %v2185_v63  ;;  %v2186_v18 = vsel %vm2174_vm0, %v2167_v60, -1e+30 }
 0x9fd   :  { %2213 = vmax.xlane.f32.xlu1 %v2186_v18  ;;  %v4001_v29 = vsel %vm2174_vm0, %v2165_v43, -1e+30 }
 0x9ff   :  { %v3043_v4 = vpop.f32.mrb[92].mxu1 }
 0xa00   :  { %2207 = vmax.xlane.f32.xlu0 %v3996_v24  ;;  %v2141_v44 = vpop.f32.mrb[93].mxu1  ;;  %v2170_v37 = vmul.f32 0.33333334, %v3043_v4 }
 0xa01   :  { %v2168_v27 = vmul.f32 0.33333334, %v2141_v44  ;;  %2209 = vmax.xlane.f32.xlu1 %v4001_v29  ;;  %v3044_v21 = vpop.f32.mrb[94].mxu1 }
 0xa02   :  { %v2144_v23 = vpop.f32.mrb[95].mxu1  ;;  %v2171_v7 = vmul.f32 0.33333334, %v3044_v21  ;;  %v4016_v35 = vsel %vm2174_vm0, %v2170_v37, -1e+30 }
 0xa03   :  { %v2169_v45 = vmul.f32 0.33333334, %v2144_v23  ;;  %v4006_v38 = vsel %vm2174_vm0, %v2168_v27, -1e+30 }
 0xa04   :  { %2215 = vmax.xlane.f32.xlu0 %v4006_v38  ;;  %v4021_v49 = vsel %vm2174_vm0, %v2171_v7, -1e+30 }
 0xa05   :  { %v4011_v8 = vsel %vm2174_vm0, %v2169_v45, -1e+30 }
 0xa06   :  { %2217 = vmax.xlane.f32.xlu1 %v4011_v8 }
 0xa08   :  { %2219 = vmax.xlane.f32.xlu0 %v4016_v35 }
 0xa0a   :  { %2221 = vmax.xlane.f32.xlu1 %v4021_v49 }
 0xa78   :  { %v2196_v36 = vpop.xlane.xlu1 %2195 }
 0xa79   :  { %v4024_v55 = vsub.f32 %v2177_v25, %v2196_v36  ;;  %v2192_v59 = vpop.xlane.xlu0 %2191 }
 0xa7a   :  { %v4026_v54 = vsub.f32 %v2175_v1, %v2192_v59 }
 0xa7b   :  { %v2243_v56 = vmul.f32 1.442695, %v4024_v55 }
 0xa7c   :  { %v2239_v57 = vmul.f32 1.442695, %v4026_v54  ;;  %v2198_v61 = vpop.xlane.xlu1 %2197 }
 0xa7d   :  { %3132 = vpow2.f32 %v2243_v56  ;;  %v4030_v10 = vsub.f32 %v2178_v30, %v2198_v61  ;;  %v2194_v51 = vpop.xlane.xlu0 %2193 }
 0xa7e   :  { %v4032_v0 = vsub.f32 %v2176_v26, %v2194_v51  ;;  %3134 = vpow2.f32 %v2239_v57 }
 0xa7f   :  { %v2245_v13 = vmul.f32 1.442695, %v4030_v10 }
 0xa80   :  { %v2241_v52 = vmul.f32 1.442695, %v4032_v0 }
 0xa81   :  { %3136 = vpow2.f32 %v2245_v13  ;;  %v2204_v5 = vpop.xlane.xlu0 %2203 }
 0xa82   :  { %v4036_v20 = vsub.f32 %v2181_v50, %v2204_v5  ;;  %v2206_v14 = vpop.xlane.xlu1 %2205  ;;  %3138 = vpow2.f32 %v2241_v52 }
 0xa83   :  { %v4038_v33 = vsub.f32 %v2182_v32, %v2206_v14 }
 0xa84   :  { %v2251_v19 = vmul.f32 1.442695, %v4036_v20 }
 0xa85   :  { %v2253_v47 = vmul.f32 1.442695, %v4038_v33  ;;  %v2200_v40 = vpop.xlane.xlu0 %2199 }
 0xa86   :  { %3140 = vpow2.f32 %v2251_v19  ;;  %v4042_v22 = vsub.f32 %v2179_v34, %v2200_v40  ;;  %v2202_v17 = vpop.xlane.xlu1 %2201 }
 0xa87   :  { %v3133_v6 = vpop.eup %3132  ;;  %v4044_v11 = vsub.f32 %v2180_v39, %v2202_v17  ;;  %3142 = vpow2.f32 %v2253_v47 }
 0xa88   :  { %v2247_v25 = vmul.f32 1.442695, %v4042_v22  ;;  %2275 = vadd.xlane.f32.xlu0 %v3133_v6  ;;  %v3135_v30 = vpop.eup %3134 }
 0xa89   :  { %v2249_v28 = vmul.f32 1.442695, %v4044_v11  ;;  %v2212_v1 = vpop.xlane.xlu0 %2211 }
 0xa8a   :  { %3144 = vpow2.f32 %v2247_v25  ;;  %v4048_v2 = vsub.f32 %v2185_v63, %v2212_v1  ;;  %v2214_v26 = vpop.xlane.xlu1 %2213 }
 0xa8b   :  { %v3137_v31 = vpop.eup %3136  ;;  %v4050_v41 = vsub.f32 %v2186_v18, %v2214_v26  ;;  %3146 = vpow2.f32 %v2249_v28 }
 0xa8c   :  { %v2259_v42 = vmul.f32 1.442695, %v4048_v2  ;;  %2271 = vadd.xlane.f32.xlu0 %v3135_v30  ;;  %2277 = vadd.xlane.f32.xlu1 %v3137_v31  ;;  %v3139_v15 = vpop.eup %3138 }
 0xa8d   :  { %v2261_v46 = vmul.f32 1.442695, %v4050_v41  ;;  %v2208_v48 = vpop.xlane.xlu0 %2207 }
 0xa8e   :  { %3148 = vpow2.f32 %v2259_v42  ;;  %v4055_v50 = vsub.f32 %v3996_v24, %v2208_v48  ;;  %v2210_v53 = vpop.xlane.xlu1 %2209 }
 0xa8f   :  { %v4058_v32 = vsub.f32 %v4001_v29, %v2210_v53  ;;  %3150 = vpow2.f32 %v2261_v46 }
 0xa90   :  { %v3141_v16 = vpop.eup %3140  ;;  %v2255_v34 = vmul.f32 1.442695, %v4055_v50  ;;  %2273 = vadd.xlane.f32.xlu1 %v3139_v15 }
 0xa91   :  { %v2257_v12 = vmul.f32 1.442695, %v4058_v32  ;;  %2283 = vadd.xlane.f32.xlu0 %v3141_v16  ;;  %v2216_v62 = vpop.xlane.xlu0 %2215  ;;  %v3143_v9 = vpop.eup %3142 }
 0xa92   :  { %3152 = vpow2.f32 %v2255_v34  ;;  %v4063_v39 = vsub.f32 %v4006_v38, %v2216_v62 }
 0xa93   :  { %v2218_v60 = vpop.xlane.xlu1 %2217  ;;  %3154 = vpow2.f32 %v2257_v12 }
 0xa94   :  { %v3145_v58 = vpop.eup %3144  ;;  %v2263_v63 = vmul.f32 1.442695, %v4063_v39  ;;  %v4067_v3 = vsub.f32 %v4011_v8, %v2218_v60  ;;  %2285 = vadd.xlane.f32.xlu1 %v3143_v9 }
 0xa95   :  { %2279 = vadd.xlane.f32.xlu0 %v3145_v58  ;;  %v2220_v43 = vpop.xlane.xlu0 %2219  ;;  %v3147_v24 = vpop.eup %3146 }
 0xa96   :  { %3156 = vpow2.f32 %v2263_v63  ;;  %v2265_v18 = vmul.f32 1.442695, %v4067_v3  ;;  %v4071_v4 = vsub.f32 %v4016_v35, %v2220_v43 }
 0xa97   :  { %v2222_v44 = vpop.xlane.xlu1 %2221 }
 0xa98   :  { %v3149_v29 = vpop.eup %3148  ;;  %3158 = vpow2.f32 %v2265_v18  ;;  %v2267_v27 = vmul.f32 1.442695, %v4071_v4  ;;  %v4075_v21 = vsub.f32 %v4021_v49, %v2222_v44  ;;  %2281 = vadd.xlane.f32.xlu1 %v3147_v24 }
 0xa99   :  { %2291 = vadd.xlane.f32.xlu0 %v3149_v29  ;;  %v3151_v37 = vpop.eup %3150 }
 0xa9a   :  { %3160 = vpow2.f32 %v2267_v27  ;;  %v2269_v23 = vmul.f32 1.442695, %v4075_v21 }
 0xa9c   :  { %v3153_v45 = vpop.eup %3152  ;;  %3162 = vpow2.f32 %v2269_v23  ;;  %2293 = vadd.xlane.f32.xlu1 %v3151_v37 }
 0xa9d   :  { %2287 = vadd.xlane.f32.xlu0 %v3153_v45  ;;  %v3155_v38 = vpop.eup %3154 }
 0xaa0   :  { %v3157_v7 = vpop.eup %3156  ;;  %2289 = vadd.xlane.f32.xlu1 %v3155_v38 }
 0xaa1   :  { %2295 = vadd.xlane.f32.xlu0 %v3157_v7 }
 0xaa2   :  { %v3159_v8 = vpop.eup %3158 }
 0xaa4   :  { %v3161_v35 = vpop.eup %3160  ;;  %2297 = vadd.xlane.f32.xlu1 %v3159_v8 }
 0xaa5   :  { %2299 = vadd.xlane.f32.xlu0 %v3161_v35 }
 0xaa6   :  { %v3163_v49 = vpop.eup %3162 }
 0xaa8   :  { %2301 = vadd.xlane.f32.xlu1 %v3163_v49 }
 0xb15   :  { %v2276_v36 = vpop.xlane.xlu0 %2275 }
 0xb16   :  { %3164 = vlog2.f32 %v2276_v36 }
 0xb19   :  { %v2272_v59 = vpop.xlane.xlu0 %2271  ;;  %v2278_v56 = vpop.xlane.xlu1 %2277 }
 0xb1a   :  { %3166 = vlog2.f32 %v2272_v59 }
 0xb1b   :  { %3168 = vlog2.f32 %v2278_v56 }
 0xb1d   :  { %v2274_v57 = vpop.xlane.xlu1 %2273 }
 0xb1e   :  { %3170 = vlog2.f32 %v2274_v57  ;;  %v2284_v61 = vpop.xlane.xlu0 %2283 }
 0xb1f   :  { %3172 = vlog2.f32 %v2284_v61 }
 0xb20   :  { %v3165_v51 = vpop.eup %3164 }
 0xb21   :  { %v2308_v13 = vmul.f32 0.6931472, %v3165_v51  ;;  %v2286_v52 = vpop.xlane.xlu1 %2285 }
 0xb22   :  { %3174 = vlog2.f32 %v2286_v52  ;;  %v2280_v5 = vpop.xlane.xlu0 %2279 }
 0xb23   :  { %v2337_v14 = vsub.f32 %v4024_v55, %v2308_v13  ;;  %3176 = vlog2.f32 %v2280_v5 }
 0xb24   :  { %v3167_v19 = vpop.eup %3166 }
 0xb25   :  { %v3169_v47 = vpop.eup %3168  ;;  %2353 = vst [vmem:[#allocation19 + $0x10] sm:$0xff] %v2337_v14  ;;  %v2304_v40 = vmul.f32 0.6931472, %v3167_v19  ;;  %v2282_v17 = vpop.xlane.xlu1 %2281 }
 0xb26   :  { %v2310_v6 = vmul.f32 0.6931472, %v3169_v47  ;;  %3178 = vlog2.f32 %v2282_v17  ;;  %v2292_v25 = vpop.xlane.xlu0 %2291 }
 0xb27   :  { %v2335_v28 = vsub.f32 %v4026_v54, %v2304_v40  ;;  %3180 = vlog2.f32 %v2292_v25 }
 0xb28   :  { %v3171_v1 = vpop.eup %3170  ;;  %v2338_v30 = vsub.f32 %v4030_v10, %v2310_v6 }
 0xb29   :  { %v3173_v26 = vpop.eup %3172  ;;  %2351 = vst [vmem:[#allocation19] sm:$0xff] %v2335_v28  ;;  %v2306_v31 = vmul.f32 0.6931472, %v3171_v1  ;;  %v2294_v42 = vpop.xlane.xlu1 %2293 }
 0xb2a   :  { %2354 = vst [vmem:[#allocation19 + $0x18] sm:$0xff] %v2338_v30  ;;  %v2316_v55 = vmul.f32 0.6931472, %v3173_v26  ;;  %3182 = vlog2.f32 %v2294_v42  ;;  %v2288_v46 = vpop.xlane.xlu0 %2287 }
 0xb2b   :  { %v2336_v48 = vsub.f32 %v4032_v0, %v2306_v31  ;;  %3184 = vlog2.f32 %v2288_v46 }
 0xb2c   :  { %v3175_v53 = vpop.eup %3174  ;;  %v2341_v15 = vsub.f32 %v4036_v20, %v2316_v55 }
 0xb2d   :  { %v3177_v16 = vpop.eup %3176  ;;  %2352 = vst [vmem:[#allocation19 + $0x8] sm:$0xff] %v2336_v48  ;;  %v2318_v54 = vmul.f32 0.6931472, %v3175_v53  ;;  %v2290_v34 = vpop.xlane.xlu1 %2289 }
 0xb2e   :  { %2357 = vst [vmem:[#allocation19 + $0x30] sm:$0xff] %v2341_v15  ;;  %v2312_v10 = vmul.f32 0.6931472, %v3177_v16  ;;  %3186 = vlog2.f32 %v2290_v34  ;;  %v2296_v12 = vpop.xlane.xlu0 %2295 }
 0xb2f   :  { %v2342_v62 = vsub.f32 %v4038_v33, %v2318_v54  ;;  %3188 = vlog2.f32 %v2296_v12 }
 0xb30   :  { %v3179_v9 = vpop.eup %3178  ;;  %v2339_v60 = vsub.f32 %v4042_v22, %v2312_v10 }
 0xb31   :  { %v3181_v58 = vpop.eup %3180  ;;  %2358 = vst [vmem:[#allocation19 + $0x38] sm:$0xff] %v2342_v62  ;;  %v2314_v0 = vmul.f32 0.6931472, %v3179_v9  ;;  %v2298_v63 = vpop.xlane.xlu1 %2297 }
 0xb32   :  { %2355 = vst [vmem:[#allocation19 + $0x20] sm:$0xff] %v2339_v60  ;;  %v2324_v20 = vmul.f32 0.6931472, %v3181_v58  ;;  %3190 = vlog2.f32 %v2298_v63  ;;  %v2300_v43 = vpop.xlane.xlu0 %2299 }
 0xb33   :  { %v2340_v18 = vsub.f32 %v4044_v11, %v2314_v0  ;;  %3192 = vlog2.f32 %v2300_v43 }
 0xb34   :  { %v3183_v24 = vpop.eup %3182  ;;  %v2345_v44 = vsub.f32 %v4048_v2, %v2324_v20 }
 0xb35   :  { %v3185_v29 = vpop.eup %3184  ;;  %2356 = vst [vmem:[#allocation19 + $0x28] sm:$0xff] %v2340_v18  ;;  %v2326_v33 = vmul.f32 0.6931472, %v3183_v24  ;;  %v2302_v27 = vpop.xlane.xlu1 %2301 }
 0xb36   :  { %2361 = vst [vmem:[#allocation19 + $0x50] sm:$0xff] %v2345_v44  ;;  %v2320_v22 = vmul.f32 0.6931472, %v3185_v29  ;;  %3194 = vlog2.f32 %v2302_v27 }
 0xb37   :  { %v2346_v23 = vsub.f32 %v4050_v41, %v2326_v33 }
 0xb38   :  { %v3187_v37 = vpop.eup %3186  ;;  %v2343_v45 = vsub.f32 %v4055_v50, %v2320_v22 }
 0xb39   :  { %v3189_v38 = vpop.eup %3188  ;;  %2362 = vst [vmem:[#allocation19 + $0x58] sm:$0xff] %v2346_v23  ;;  %v2322_v7 = vmul.f32 0.6931472, %v3187_v37 }
 0xb3a   :  { %2359 = vst [vmem:[#allocation19 + $0x40] sm:$0xff] %v2343_v45  ;;  %v2328_v11 = vmul.f32 0.6931472, %v3189_v38 }
 0xb3b   :  { %v2344_v8 = vsub.f32 %v4058_v32, %v2322_v7 }
 0xb3c   :  { %v3191_v2 = vpop.eup %3190  ;;  %v2347_v35 = vsub.f32 %v4063_v39, %v2328_v11 }
 0xb3d   :  { %v3193_v49 = vpop.eup %3192  ;;  %2360 = vst [vmem:[#allocation19 + $0x48] sm:$0xff] %v2344_v8  ;;  %v2330_v36 = vmul.f32 0.6931472, %v3191_v2 }
 0xb3e   :  { %2363 = vst [vmem:[#allocation19 + $0x60] sm:$0xff] %v2347_v35  ;;  %v2332_v59 = vmul.f32 0.6931472, %v3193_v49 }
 0xb3f   :  { %v2348_v41 = vsub.f32 %v4067_v3, %v2330_v36 }
 0xb40   :  { %v3195_v56 = vpop.eup %3194  ;;  %v2349_v50 = vsub.f32 %v4071_v4, %v2332_v59 }
 0xb41   :  { %2364 = vst [vmem:[#allocation19 + $0x68] sm:$0xff] %v2348_v41  ;;  %v2334_v57 = vmul.f32 0.6931472, %v3195_v56 }
 0xb42   :  { %2365 = vst [vmem:[#allocation19 + $0x70] sm:$0xff] %v2349_v50 }
 0xb43   :  { %v2350_v32 = vsub.f32 %v4075_v21, %v2334_v57 }
 0xb45   :  { %2366 = vst [vmem:[#allocation19 + $0x78] sm:$0xff] %v2350_v32 }
 0xb46   :  { %3435 = shalt.err (!%p3432_p0)
}
 0xb47   :  { %s3436_s28 = scalar_lea.hbm %s4118_s12, 2048 }
 0xb48   :  { %p3437_p1 = scmp.ne.s32.totalorder %s4118_s12, %s3436_s28  ;;  %p3440_p2 = scmp.lt.u32.totalorder %s3436_s28, %s4118_s12 }
 0xb4a   :  { %p3442_p3 = pnand %p3440_p2, %p3437_p1 }
 0xb4c   :  { %3445 = shalt.err (!%p3442_p3)
}
 0xb4d   :  { %s3473_s29 = smov 128   ;;  %s3474_s3 = smov 8  }
 0xb4e   :  { %2378 = dma.vmem_to_hbm [thread:$0]  %s2373_s25, 2048, %s4118_s12, [#allocation6], %s3473_s29, %s3473_s29, %s3474_s3  }
 0xb4f   :  { %3458 = dma.done.wait [#allocation6], 2048  }
 0xb50   :  { %3459 = vsyncadd [#allocation6], 4294965248 }
 0xb51   :  { %2382 = vsyncpa [#allocation5], 1 }
 0xb52   :  { %2383 = vsyncpa [#allocation8], 1 }
 0xb53   :  { %2384 = vsyncpa [#allocation11], 1 }
 0xb54   :  { %2385 = vsyncpa [#allocation14], 1 }
 0xb55   :  { %2386 = vsyncpa [#allocation17], 1 }
 0xb56   :  { %2387 = vsyncpa [#allocation6], 1 }
 0xb57   :  { %2388 = vsyncmov [#allocation3] }
 0xb5a   :  { %s2389_s11 = vpop.sfrf %2388 }
 0xb5b   :  { %p2468_p4 = scmp.ne.s32.totalorder %s2389_s11, 0 }
 0xb5d   :  { %2393 = shalt.err (%p2468_p4)  }

</bundles_post_ra>
